<compile_context>
chip_gen: v5e
topology: v5e:2x2
jax: 0.10.0
libtpu: 0.0.40
codegen_flags: <defaults>
</compile_context>

<pallas_src>
import functools

import jax
import jax.numpy as jnp
from jax.experimental import pallas as pl
from jax.experimental.pallas import tpu as pltpu


def lstm_kernel(x_ref, wih_ref, whh_ref, b_ref, wfc_ref, bfc_ref, y_ref,
                *, seq_len, batch, hidden_size):
    """Single invocation: whole sequence resident in VMEM, unrolled recurrence."""
    T, B, H = seq_len, batch, hidden_size

    # ---- Hoisted input projection: one bf16 MXU matmul for ALL time steps ---
    gates_x = (jnp.dot(x_ref[...].astype(jnp.bfloat16),
                       wih_ref[...].astype(jnp.bfloat16),
                       preferred_element_type=jnp.float32)
               + b_ref[...])                                    # (T*B, 4H) f32

    # W_hh cast ONCE to bf16: halves the per-step weight streaming on the
    # serial h->h chain.
    # TODO(synk): for an even tighter loop, hold the (H, 4H) RHS resident in
    # the MXU via pltpu.matmul_push_rhs / matmul_acc_lhs / matmul_pop.
    whh_bf = whh_ref[...].astype(jnp.bfloat16)                  # (H, 4H)

    h = jnp.zeros((B, H), jnp.float32)
    c = jnp.zeros((B, H), jnp.float32)
    hs_rows = []  # per-step h[B-1] rows; stays in registers (loop is unrolled)

    # ---- Fully-unrolled recurrence (only h @ W_hh^T is serialized) ----------
    for t in range(T):
        g = gates_x[t * B:(t + 1) * B, :] + jnp.dot(
            h.astype(jnp.bfloat16), whh_bf,
            preferred_element_type=jnp.float32)                 # (B, 4H) f32
        # PyTorch gate order [i, f, g, o]; H = 128 -> lane-aligned slices.
        i_g = jax.nn.sigmoid(g[:, 0:H])
        f_g = jax.nn.sigmoid(g[:, H:2 * H])
        g_g = jnp.tanh(g[:, 2 * H:3 * H])
        o_g = jax.nn.sigmoid(g[:, 3 * H:4 * H])
        c = f_g * c + i_g * g_g
        h = o_g * jnp.tanh(c)
        # output[:, -1, :][t] == hidden state of the LAST batch row at step t.
        hs_rows.append(h[B - 1:B, :])

    # ---- Epilogue: fc as VPU mul + lane reduction, then one store -----------
    hs = jnp.concatenate(hs_rows, axis=0)                       # (T, H)
    y = jax.nn.sigmoid(
        jnp.sum(hs * wfc_ref[...], axis=-1, keepdims=True) + bfc_ref[...])
    y_ref[...] = y                                              # (T, 1)


def lstm_model_forward(x, params):
    """x: (T, B, D) float32 -> (T, 1) float32 (matches LSTMModel.forward)."""
    T, B, D = x.shape
    wih_t = params["wih_t"]   # (D, 4H)
    whh_t = params["whh_t"]   # (H, 4H)
    b = params["b"]           # (1, 4H)   (b_ih + b_hh)
    wfc = params["wfc"]       # (1, H)    fc.weight as a row (VPU fc path)
    bfc = params["bfc"]       # (1, 1)
    H = whh_t.shape[0]

    kernel = functools.partial(lstm_kernel, seq_len=T, batch=B, hidden_size=H)
    x2d = x.reshape(T * B, D)     # free contiguous reshape, time-major rows

    vmem = pltpu.MemorySpace.VMEM
    # TODO(synk): for long sequences, chunk the time axis with a grid marked
    # "arbitrary", persist h/c in VMEM scratch across grid steps (P3 pattern),
    # compute the input projection per chunk, and size chunks against v7x's
    # 64 MiB VMEM via pltpu.CompilerParams(vmem_limit_bytes=...).
    # TODO(synk): with multiple independent sequences, add a leading "parallel"
    # grid axis so both of v7x's TensorCores get work; a single recurrence can
    # only occupy one TC.
    return pl.pallas_call(
        kernel,
        out_shape=jax.ShapeDtypeStruct((T, 1), jnp.float32),
        in_specs=[
            pl.BlockSpec(memory_space=vmem),   # x (T*B, D)
            pl.BlockSpec(memory_space=vmem),   # W_ih^T    (D, 4H)
            pl.BlockSpec(memory_space=vmem),   # W_hh^T    (H, 4H)
            pl.BlockSpec(memory_space=vmem),   # b_ih+b_hh (1, 4H)
            pl.BlockSpec(memory_space=vmem),   # fc.weight (1, H)
            pl.BlockSpec(memory_space=vmem),   # fc.bias   (1, 1)
        ],
        out_specs=pl.BlockSpec(memory_space=vmem),
    )(x2d, wih_t, whh_t, b, wfc, bfc)


def init_params(key, input_size, hidden_size, output_size=1):
    """Deterministic init matching nn.LSTM / nn.Linear parameter shapes."""
    D, H = input_size, hidden_size
    ks = jax.random.split(key, 8)
    bound = 1.0 / jnp.sqrt(H)
    u = lambda k, shape, b: jax.random.uniform(k, shape, jnp.float32, -b, b)

    w_ih = u(ks[0], (4 * H, D), bound)        # weight_ih_l0
    w_hh = u(ks[1], (4 * H, H), bound)        # weight_hh_l0
    b_ih = u(ks[2], (4 * H,), bound)          # bias_ih_l0
    b_hh = u(ks[3], (4 * H,), bound)          # bias_hh_l0
    w_fc = u(ks[4], (output_size, H), bound)  # fc.weight
    b_fc = u(ks[5], (output_size,), bound)    # fc.bias

    return {
        "wih_t": jnp.transpose(w_ih),                  # (D, 4H)
        "whh_t": jnp.transpose(w_hh),                  # (H, 4H)
        "b": (b_ih + b_hh).reshape(1, 4 * H),
        "wfc": w_fc.reshape(output_size, H),           # (1, H) row for VPU fc
        "bfc": b_fc.reshape(1, 1),
        # originals for the pure-JAX reference
        "_w_ih": w_ih, "_w_hh": w_hh, "_b_ih": b_ih, "_b_hh": b_hh,
        "_w_fc": w_fc, "_b_fc": b_fc,
    }


def reference_forward(x, params):
    """Pure-JAX f32 reference of LSTMModel.forward for verification."""
    T, B, D = x.shape
    H = params["_w_hh"].shape[1]
    w_ih, w_hh = params["_w_ih"], params["_w_hh"]
    b = params["_b_ih"] + params["_b_hh"]

    def step(carry, x_t):
        h, c = carry
        gates = x_t @ w_ih.T + h @ w_hh.T + b
        i = jax.nn.sigmoid(gates[:, 0:H])
        f = jax.nn.sigmoid(gates[:, H:2 * H])
        g = jnp.tanh(gates[:, 2 * H:3 * H])
        o = jax.nn.sigmoid(gates[:, 3 * H:4 * H])
        c = f * c + i * g
        h = o * jnp.tanh(c)
        return (h, c), h

    h0 = jnp.zeros((B, H), jnp.float32)
    c0 = jnp.zeros((B, H), jnp.float32)
    _, hs = jax.lax.scan(step, (h0, c0), x)          # (T, B, H)
    out = hs[:, -1, :]                               # output[:, -1, :] -> (T, H)
    out = out @ params["_w_fc"].T + params["_b_fc"]  # (T, 1)
    return jax.nn.sigmoid(out)


if __name__ == "__main__":
    # seq_len, batch, input_size, hidden_size (hidden matches the spec's 128).
    # B=8 fills all 8 LHS sublanes of the per-step MXU push (free vs. B=2).
    T, B, D, H = 8, 8, 16, 128

    key = jax.random.PRNGKey(0)
    k_x, k_p = jax.random.split(key)
    x = jax.random.normal(k_x, (T, B, D), dtype=jnp.float32)
    params = init_params(k_p, D, H, output_size=1)

    y = jax.block_until_ready(lstm_model_forward(x, params))
    y_ref = jax.block_until_ready(reference_forward(x, params))

    assert y.shape == (T, 1)
    # Tolerance intentionally loosened vs. the pure-f32 reference: matmul
    # operands are bf16 (f32 accumulation) per the perf review.
    assert jnp.allclose(y, y_ref, atol=2e-2, rtol=0.0), (y, y_ref)

    print("KERNEL_OK")
</pallas_src>

<mosaic_0001>
module attributes {stable_mosaic.version = 11 : i64} {
  func.func @lstm_kernel(%arg0: memref<64x16xf32, #tpu.memory_space<vmem>>, %arg1: memref<16x512xf32, #tpu.memory_space<vmem>>, %arg2: memref<128x512xf32, #tpu.memory_space<vmem>>, %arg3: memref<1x512xf32, #tpu.memory_space<vmem>>, %arg4: memref<1x128xf32, #tpu.memory_space<vmem>>, %arg5: memref<1x1xf32, #tpu.memory_space<vmem>>, %arg6: memref<8x1xf32, #tpu.memory_space<vmem>>) attributes {dimension_semantics = [], scalar_prefetch = 0 : i64, scratch_operands = 0 : i64, tpu.core_type = #tpu.core_type<tc>} {
    %c0 = arith.constant 0 : index
    %c0_0 = arith.constant 0 : index
    %0 = vector.load %arg0[%c0, %c0_0] : memref<64x16xf32, #tpu.memory_space<vmem>>, vector<64x16xf32>
    %1 = arith.truncf %0 : vector<64x16xf32> to vector<64x16xbf16>
    %c0_1 = arith.constant 0 : index
    %c0_2 = arith.constant 0 : index
    %2 = vector.load %arg1[%c0_1, %c0_2] : memref<16x512xf32, #tpu.memory_space<vmem>>, vector<16x512xf32>
    %3 = arith.truncf %2 : vector<16x512xf32> to vector<16x512xbf16>
    %cst = arith.constant dense<0.000000e+00> : vector<64x512xf32>
    %4 = tpu.matmul %1, %3, %cst {dimension_numbers = #tpu.dot_dimension_numbers<[1], [0], [0], [1], [0, 0, 1, 1], [], []>} : vector<64x16xbf16>, vector<16x512xbf16>, vector<64x512xf32> -> vector<64x512xf32>
    %c0_3 = arith.constant 0 : index
    %c0_4 = arith.constant 0 : index
    %5 = vector.load %arg3[%c0_3, %c0_4] : memref<1x512xf32, #tpu.memory_space<vmem>>, vector<1x512xf32>
    %6 = vector.broadcast %5 : vector<1x512xf32> to vector<64x512xf32>
    %7 = arith.addf %4, %6 : vector<64x512xf32>
    %c0_5 = arith.constant 0 : index
    %c0_6 = arith.constant 0 : index
    %8 = vector.load %arg2[%c0_5, %c0_6] : memref<128x512xf32, #tpu.memory_space<vmem>>, vector<128x512xf32>
    %9 = arith.truncf %8 : vector<128x512xf32> to vector<128x512xbf16>
    %cst_7 = arith.constant 0.000000e+00 : f32
    %10 = vector.broadcast %cst_7 : f32 to vector<8x128xf32>
    %cst_8 = arith.constant 0.000000e+00 : f32
    %11 = vector.broadcast %cst_8 : f32 to vector<8x128xf32>
    %12 = vector.extract_strided_slice %7 {offsets = [0, 0], sizes = [8, 512], strides = [1, 1]} : vector<64x512xf32> to vector<8x512xf32>
    %13 = arith.truncf %10 : vector<8x128xf32> to vector<8x128xbf16>
    %cst_9 = arith.constant dense<0.000000e+00> : vector<8x512xf32>
    %14 = tpu.matmul %13, %9, %cst_9 {dimension_numbers = #tpu.dot_dimension_numbers<[1], [0], [0], [1], [0, 0, 1, 1], [], []>} : vector<8x128xbf16>, vector<128x512xbf16>, vector<8x512xf32> -> vector<8x512xf32>
    %15 = arith.addf %12, %14 : vector<8x512xf32>
    %16 = vector.extract_strided_slice %15 {offsets = [0, 0], sizes = [8, 128], strides = [1, 1]} : vector<8x512xf32> to vector<8x128xf32>
    %17 = arith.negf %16 : vector<8x128xf32>
    %18 = math.exp %17 : vector<8x128xf32>
    %cst_10 = arith.constant 1.000000e+00 : f32
    %19 = vector.broadcast %cst_10 : f32 to vector<8x128xf32>
    %20 = arith.addf %19, %18 : vector<8x128xf32>
    %21 = arith.divf %19, %20 : vector<8x128xf32>
    %22 = vector.extract_strided_slice %15 {offsets = [0, 128], sizes = [8, 128], strides = [1, 1]} : vector<8x512xf32> to vector<8x128xf32>
    %23 = arith.negf %22 : vector<8x128xf32>
    %24 = math.exp %23 : vector<8x128xf32>
    %cst_11 = arith.constant 1.000000e+00 : f32
    %25 = vector.broadcast %cst_11 : f32 to vector<8x128xf32>
    %26 = arith.addf %25, %24 : vector<8x128xf32>
    %27 = arith.divf %25, %26 : vector<8x128xf32>
    %28 = vector.extract_strided_slice %15 {offsets = [0, 256], sizes = [8, 128], strides = [1, 1]} : vector<8x512xf32> to vector<8x128xf32>
    %29 = math.tanh %28 : vector<8x128xf32>
    %30 = vector.extract_strided_slice %15 {offsets = [0, 384], sizes = [8, 128], strides = [1, 1]} : vector<8x512xf32> to vector<8x128xf32>
    %31 = arith.negf %30 : vector<8x128xf32>
    %32 = math.exp %31 : vector<8x128xf32>
    %cst_12 = arith.constant 1.000000e+00 : f32
    %33 = vector.broadcast %cst_12 : f32 to vector<8x128xf32>
    %34 = arith.addf %33, %32 : vector<8x128xf32>
    %35 = arith.divf %33, %34 : vector<8x128xf32>
    %36 = arith.mulf %27, %11 : vector<8x128xf32>
    %37 = arith.mulf %21, %29 : vector<8x128xf32>
    %38 = arith.addf %36, %37 : vector<8x128xf32>
    %39 = math.tanh %38 : vector<8x128xf32>
    %40 = arith.mulf %35, %39 : vector<8x128xf32>
    %41 = vector.extract_strided_slice %40 {offsets = [7, 0], sizes = [1, 128], strides = [1, 1]} : vector<8x128xf32> to vector<1x128xf32>
    %42 = vector.extract_strided_slice %7 {offsets = [8, 0], sizes = [8, 512], strides = [1, 1]} : vector<64x512xf32> to vector<8x512xf32>
    %43 = arith.truncf %40 : vector<8x128xf32> to vector<8x128xbf16>
    %cst_13 = arith.constant dense<0.000000e+00> : vector<8x512xf32>
    %44 = tpu.matmul %43, %9, %cst_13 {dimension_numbers = #tpu.dot_dimension_numbers<[1], [0], [0], [1], [0, 0, 1, 1], [], []>} : vector<8x128xbf16>, vector<128x512xbf16>, vector<8x512xf32> -> vector<8x512xf32>
    %45 = arith.addf %42, %44 : vector<8x512xf32>
    %46 = vector.extract_strided_slice %45 {offsets = [0, 0], sizes = [8, 128], strides = [1, 1]} : vector<8x512xf32> to vector<8x128xf32>
    %47 = arith.negf %46 : vector<8x128xf32>
    %48 = math.exp %47 : vector<8x128xf32>
    %cst_14 = arith.constant 1.000000e+00 : f32
    %49 = vector.broadcast %cst_14 : f32 to vector<8x128xf32>
    %50 = arith.addf %49, %48 : vector<8x128xf32>
    %51 = arith.divf %49, %50 : vector<8x128xf32>
    %52 = vector.extract_strided_slice %45 {offsets = [0, 128], sizes = [8, 128], strides = [1, 1]} : vector<8x512xf32> to vector<8x128xf32>
    %53 = arith.negf %52 : vector<8x128xf32>
    %54 = math.exp %53 : vector<8x128xf32>
    %cst_15 = arith.constant 1.000000e+00 : f32
    %55 = vector.broadcast %cst_15 : f32 to vector<8x128xf32>
    %56 = arith.addf %55, %54 : vector<8x128xf32>
    %57 = arith.divf %55, %56 : vector<8x128xf32>
    %58 = vector.extract_strided_slice %45 {offsets = [0, 256], sizes = [8, 128], strides = [1, 1]} : vector<8x512xf32> to vector<8x128xf32>
    %59 = math.tanh %58 : vector<8x128xf32>
    %60 = vector.extract_strided_slice %45 {offsets = [0, 384], sizes = [8, 128], strides = [1, 1]} : vector<8x512xf32> to vector<8x128xf32>
    %61 = arith.negf %60 : vector<8x128xf32>
    %62 = math.exp %61 : vector<8x128xf32>
    %cst_16 = arith.constant 1.000000e+00 : f32
    %63 = vector.broadcast %cst_16 : f32 to vector<8x128xf32>
    %64 = arith.addf %63, %62 : vector<8x128xf32>
    %65 = arith.divf %63, %64 : vector<8x128xf32>
    %66 = arith.mulf %57, %38 : vector<8x128xf32>
    %67 = arith.mulf %51, %59 : vector<8x128xf32>
    %68 = arith.addf %66, %67 : vector<8x128xf32>
    %69 = math.tanh %68 : vector<8x128xf32>
    %70 = arith.mulf %65, %69 : vector<8x128xf32>
    %71 = vector.extract_strided_slice %70 {offsets = [7, 0], sizes = [1, 128], strides = [1, 1]} : vector<8x128xf32> to vector<1x128xf32>
    %72 = vector.extract_strided_slice %7 {offsets = [16, 0], sizes = [8, 512], strides = [1, 1]} : vector<64x512xf32> to vector<8x512xf32>
    %73 = arith.truncf %70 : vector<8x128xf32> to vector<8x128xbf16>
    %cst_17 = arith.constant dense<0.000000e+00> : vector<8x512xf32>
    %74 = tpu.matmul %73, %9, %cst_17 {dimension_numbers = #tpu.dot_dimension_numbers<[1], [0], [0], [1], [0, 0, 1, 1], [], []>} : vector<8x128xbf16>, vector<128x512xbf16>, vector<8x512xf32> -> vector<8x512xf32>
    %75 = arith.addf %72, %74 : vector<8x512xf32>
    %76 = vector.extract_strided_slice %75 {offsets = [0, 0], sizes = [8, 128], strides = [1, 1]} : vector<8x512xf32> to vector<8x128xf32>
    %77 = arith.negf %76 : vector<8x128xf32>
    %78 = math.exp %77 : vector<8x128xf32>
    %cst_18 = arith.constant 1.000000e+00 : f32
    %79 = vector.broadcast %cst_18 : f32 to vector<8x128xf32>
    %80 = arith.addf %79, %78 : vector<8x128xf32>
    %81 = arith.divf %79, %80 : vector<8x128xf32>
    %82 = vector.extract_strided_slice %75 {offsets = [0, 128], sizes = [8, 128], strides = [1, 1]} : vector<8x512xf32> to vector<8x128xf32>
    %83 = arith.negf %82 : vector<8x128xf32>
    %84 = math.exp %83 : vector<8x128xf32>
    %cst_19 = arith.constant 1.000000e+00 : f32
    %85 = vector.broadcast %cst_19 : f32 to vector<8x128xf32>
    %86 = arith.addf %85, %84 : vector<8x128xf32>
    %87 = arith.divf %85, %86 : vector<8x128xf32>
    %88 = vector.extract_strided_slice %75 {offsets = [0, 256], sizes = [8, 128], strides = [1, 1]} : vector<8x512xf32> to vector<8x128xf32>
    %89 = math.tanh %88 : vector<8x128xf32>
    %90 = vector.extract_strided_slice %75 {offsets = [0, 384], sizes = [8, 128], strides = [1, 1]} : vector<8x512xf32> to vector<8x128xf32>
    %91 = arith.negf %90 : vector<8x128xf32>
    %92 = math.exp %91 : vector<8x128xf32>
    %cst_20 = arith.constant 1.000000e+00 : f32
    %93 = vector.broadcast %cst_20 : f32 to vector<8x128xf32>
    %94 = arith.addf %93, %92 : vector<8x128xf32>
    %95 = arith.divf %93, %94 : vector<8x128xf32>
    %96 = arith.mulf %87, %68 : vector<8x128xf32>
    %97 = arith.mulf %81, %89 : vector<8x128xf32>
    %98 = arith.addf %96, %97 : vector<8x128xf32>
    %99 = math.tanh %98 : vector<8x128xf32>
    %100 = arith.mulf %95, %99 : vector<8x128xf32>
    %101 = vector.extract_strided_slice %100 {offsets = [7, 0], sizes = [1, 128], strides = [1, 1]} : vector<8x128xf32> to vector<1x128xf32>
    %102 = vector.extract_strided_slice %7 {offsets = [24, 0], sizes = [8, 512], strides = [1, 1]} : vector<64x512xf32> to vector<8x512xf32>
    %103 = arith.truncf %100 : vector<8x128xf32> to vector<8x128xbf16>
    %cst_21 = arith.constant dense<0.000000e+00> : vector<8x512xf32>
    %104 = tpu.matmul %103, %9, %cst_21 {dimension_numbers = #tpu.dot_dimension_numbers<[1], [0], [0], [1], [0, 0, 1, 1], [], []>} : vector<8x128xbf16>, vector<128x512xbf16>, vector<8x512xf32> -> vector<8x512xf32>
    %105 = arith.addf %102, %104 : vector<8x512xf32>
    %106 = vector.extract_strided_slice %105 {offsets = [0, 0], sizes = [8, 128], strides = [1, 1]} : vector<8x512xf32> to vector<8x128xf32>
    %107 = arith.negf %106 : vector<8x128xf32>
    %108 = math.exp %107 : vector<8x128xf32>
    %cst_22 = arith.constant 1.000000e+00 : f32
    %109 = vector.broadcast %cst_22 : f32 to vector<8x128xf32>
    %110 = arith.addf %109, %108 : vector<8x128xf32>
    %111 = arith.divf %109, %110 : vector<8x128xf32>
    %112 = vector.extract_strided_slice %105 {offsets = [0, 128], sizes = [8, 128], strides = [1, 1]} : vector<8x512xf32> to vector<8x128xf32>
    %113 = arith.negf %112 : vector<8x128xf32>
    %114 = math.exp %113 : vector<8x128xf32>
    %cst_23 = arith.constant 1.000000e+00 : f32
    %115 = vector.broadcast %cst_23 : f32 to vector<8x128xf32>
    %116 = arith.addf %115, %114 : vector<8x128xf32>
    %117 = arith.divf %115, %116 : vector<8x128xf32>
    %118 = vector.extract_strided_slice %105 {offsets = [0, 256], sizes = [8, 128], strides = [1, 1]} : vector<8x512xf32> to vector<8x128xf32>
    %119 = math.tanh %118 : vector<8x128xf32>
    %120 = vector.extract_strided_slice %105 {offsets = [0, 384], sizes = [8, 128], strides = [1, 1]} : vector<8x512xf32> to vector<8x128xf32>
    %121 = arith.negf %120 : vector<8x128xf32>
    %122 = math.exp %121 : vector<8x128xf32>
    %cst_24 = arith.constant 1.000000e+00 : f32
    %123 = vector.broadcast %cst_24 : f32 to vector<8x128xf32>
    %124 = arith.addf %123, %122 : vector<8x128xf32>
    %125 = arith.divf %123, %124 : vector<8x128xf32>
    %126 = arith.mulf %117, %98 : vector<8x128xf32>
    %127 = arith.mulf %111, %119 : vector<8x128xf32>
    %128 = arith.addf %126, %127 : vector<8x128xf32>
    %129 = math.tanh %128 : vector<8x128xf32>
    %130 = arith.mulf %125, %129 : vector<8x128xf32>
    %131 = vector.extract_strided_slice %130 {offsets = [7, 0], sizes = [1, 128], strides = [1, 1]} : vector<8x128xf32> to vector<1x128xf32>
    %132 = vector.extract_strided_slice %7 {offsets = [32, 0], sizes = [8, 512], strides = [1, 1]} : vector<64x512xf32> to vector<8x512xf32>
    %133 = arith.truncf %130 : vector<8x128xf32> to vector<8x128xbf16>
    %cst_25 = arith.constant dense<0.000000e+00> : vector<8x512xf32>
    %134 = tpu.matmul %133, %9, %cst_25 {dimension_numbers = #tpu.dot_dimension_numbers<[1], [0], [0], [1], [0, 0, 1, 1], [], []>} : vector<8x128xbf16>, vector<128x512xbf16>, vector<8x512xf32> -> vector<8x512xf32>
    %135 = arith.addf %132, %134 : vector<8x512xf32>
    %136 = vector.extract_strided_slice %135 {offsets = [0, 0], sizes = [8, 128], strides = [1, 1]} : vector<8x512xf32> to vector<8x128xf32>
    %137 = arith.negf %136 : vector<8x128xf32>
    %138 = math.exp %137 : vector<8x128xf32>
    %cst_26 = arith.constant 1.000000e+00 : f32
    %139 = vector.broadcast %cst_26 : f32 to vector<8x128xf32>
    %140 = arith.addf %139, %138 : vector<8x128xf32>
    %141 = arith.divf %139, %140 : vector<8x128xf32>
    %142 = vector.extract_strided_slice %135 {offsets = [0, 128], sizes = [8, 128], strides = [1, 1]} : vector<8x512xf32> to vector<8x128xf32>
    %143 = arith.negf %142 : vector<8x128xf32>
    %144 = math.exp %143 : vector<8x128xf32>
    %cst_27 = arith.constant 1.000000e+00 : f32
    %145 = vector.broadcast %cst_27 : f32 to vector<8x128xf32>
    %146 = arith.addf %145, %144 : vector<8x128xf32>
    %147 = arith.divf %145, %146 : vector<8x128xf32>
    %148 = vector.extract_strided_slice %135 {offsets = [0, 256], sizes = [8, 128], strides = [1, 1]} : vector<8x512xf32> to vector<8x128xf32>
    %149 = math.tanh %148 : vector<8x128xf32>
    %150 = vector.extract_strided_slice %135 {offsets = [0, 384], sizes = [8, 128], strides = [1, 1]} : vector<8x512xf32> to vector<8x128xf32>
    %151 = arith.negf %150 : vector<8x128xf32>
    %152 = math.exp %151 : vector<8x128xf32>
    %cst_28 = arith.constant 1.000000e+00 : f32
    %153 = vector.broadcast %cst_28 : f32 to vector<8x128xf32>
    %154 = arith.addf %153, %152 : vector<8x128xf32>
    %155 = arith.divf %153, %154 : vector<8x128xf32>
    %156 = arith.mulf %147, %128 : vector<8x128xf32>
    %157 = arith.mulf %141, %149 : vector<8x128xf32>
    %158 = arith.addf %156, %157 : vector<8x128xf32>
    %159 = math.tanh %158 : vector<8x128xf32>
    %160 = arith.mulf %155, %159 : vector<8x128xf32>
    %161 = vector.extract_strided_slice %160 {offsets = [7, 0], sizes = [1, 128], strides = [1, 1]} : vector<8x128xf32> to vector<1x128xf32>
    %162 = vector.extract_strided_slice %7 {offsets = [40, 0], sizes = [8, 512], strides = [1, 1]} : vector<64x512xf32> to vector<8x512xf32>
    %163 = arith.truncf %160 : vector<8x128xf32> to vector<8x128xbf16>
    %cst_29 = arith.constant dense<0.000000e+00> : vector<8x512xf32>
    %164 = tpu.matmul %163, %9, %cst_29 {dimension_numbers = #tpu.dot_dimension_numbers<[1], [0], [0], [1], [0, 0, 1, 1], [], []>} : vector<8x128xbf16>, vector<128x512xbf16>, vector<8x512xf32> -> vector<8x512xf32>
    %165 = arith.addf %162, %164 : vector<8x512xf32>
    %166 = vector.extract_strided_slice %165 {offsets = [0, 0], sizes = [8, 128], strides = [1, 1]} : vector<8x512xf32> to vector<8x128xf32>
    %167 = arith.negf %166 : vector<8x128xf32>
    %168 = math.exp %167 : vector<8x128xf32>
    %cst_30 = arith.constant 1.000000e+00 : f32
    %169 = vector.broadcast %cst_30 : f32 to vector<8x128xf32>
    %170 = arith.addf %169, %168 : vector<8x128xf32>
    %171 = arith.divf %169, %170 : vector<8x128xf32>
    %172 = vector.extract_strided_slice %165 {offsets = [0, 128], sizes = [8, 128], strides = [1, 1]} : vector<8x512xf32> to vector<8x128xf32>
    %173 = arith.negf %172 : vector<8x128xf32>
    %174 = math.exp %173 : vector<8x128xf32>
    %cst_31 = arith.constant 1.000000e+00 : f32
    %175 = vector.broadcast %cst_31 : f32 to vector<8x128xf32>
    %176 = arith.addf %175, %174 : vector<8x128xf32>
    %177 = arith.divf %175, %176 : vector<8x128xf32>
    %178 = vector.extract_strided_slice %165 {offsets = [0, 256], sizes = [8, 128], strides = [1, 1]} : vector<8x512xf32> to vector<8x128xf32>
    %179 = math.tanh %178 : vector<8x128xf32>
    %180 = vector.extract_strided_slice %165 {offsets = [0, 384], sizes = [8, 128], strides = [1, 1]} : vector<8x512xf32> to vector<8x128xf32>
    %181 = arith.negf %180 : vector<8x128xf32>
    %182 = math.exp %181 : vector<8x128xf32>
    %cst_32 = arith.constant 1.000000e+00 : f32
    %183 = vector.broadcast %cst_32 : f32 to vector<8x128xf32>
    %184 = arith.addf %183, %182 : vector<8x128xf32>
    %185 = arith.divf %183, %184 : vector<8x128xf32>
    %186 = arith.mulf %177, %158 : vector<8x128xf32>
    %187 = arith.mulf %171, %179 : vector<8x128xf32>
    %188 = arith.addf %186, %187 : vector<8x128xf32>
    %189 = math.tanh %188 : vector<8x128xf32>
    %190 = arith.mulf %185, %189 : vector<8x128xf32>
    %191 = vector.extract_strided_slice %190 {offsets = [7, 0], sizes = [1, 128], strides = [1, 1]} : vector<8x128xf32> to vector<1x128xf32>
    %192 = vector.extract_strided_slice %7 {offsets = [48, 0], sizes = [8, 512], strides = [1, 1]} : vector<64x512xf32> to vector<8x512xf32>
    %193 = arith.truncf %190 : vector<8x128xf32> to vector<8x128xbf16>
    %cst_33 = arith.constant dense<0.000000e+00> : vector<8x512xf32>
    %194 = tpu.matmul %193, %9, %cst_33 {dimension_numbers = #tpu.dot_dimension_numbers<[1], [0], [0], [1], [0, 0, 1, 1], [], []>} : vector<8x128xbf16>, vector<128x512xbf16>, vector<8x512xf32> -> vector<8x512xf32>
    %195 = arith.addf %192, %194 : vector<8x512xf32>
    %196 = vector.extract_strided_slice %195 {offsets = [0, 0], sizes = [8, 128], strides = [1, 1]} : vector<8x512xf32> to vector<8x128xf32>
    %197 = arith.negf %196 : vector<8x128xf32>
    %198 = math.exp %197 : vector<8x128xf32>
    %cst_34 = arith.constant 1.000000e+00 : f32
    %199 = vector.broadcast %cst_34 : f32 to vector<8x128xf32>
    %200 = arith.addf %199, %198 : vector<8x128xf32>
    %201 = arith.divf %199, %200 : vector<8x128xf32>
    %202 = vector.extract_strided_slice %195 {offsets = [0, 128], sizes = [8, 128], strides = [1, 1]} : vector<8x512xf32> to vector<8x128xf32>
    %203 = arith.negf %202 : vector<8x128xf32>
    %204 = math.exp %203 : vector<8x128xf32>
    %cst_35 = arith.constant 1.000000e+00 : f32
    %205 = vector.broadcast %cst_35 : f32 to vector<8x128xf32>
    %206 = arith.addf %205, %204 : vector<8x128xf32>
    %207 = arith.divf %205, %206 : vector<8x128xf32>
    %208 = vector.extract_strided_slice %195 {offsets = [0, 256], sizes = [8, 128], strides = [1, 1]} : vector<8x512xf32> to vector<8x128xf32>
    %209 = math.tanh %208 : vector<8x128xf32>
    %210 = vector.extract_strided_slice %195 {offsets = [0, 384], sizes = [8, 128], strides = [1, 1]} : vector<8x512xf32> to vector<8x128xf32>
    %211 = arith.negf %210 : vector<8x128xf32>
    %212 = math.exp %211 : vector<8x128xf32>
    %cst_36 = arith.constant 1.000000e+00 : f32
    %213 = vector.broadcast %cst_36 : f32 to vector<8x128xf32>
    %214 = arith.addf %213, %212 : vector<8x128xf32>
    %215 = arith.divf %213, %214 : vector<8x128xf32>
    %216 = arith.mulf %207, %188 : vector<8x128xf32>
    %217 = arith.mulf %201, %209 : vector<8x128xf32>
    %218 = arith.addf %216, %217 : vector<8x128xf32>
    %219 = math.tanh %218 : vector<8x128xf32>
    %220 = arith.mulf %215, %219 : vector<8x128xf32>
    %221 = vector.extract_strided_slice %220 {offsets = [7, 0], sizes = [1, 128], strides = [1, 1]} : vector<8x128xf32> to vector<1x128xf32>
    %222 = vector.extract_strided_slice %7 {offsets = [56, 0], sizes = [8, 512], strides = [1, 1]} : vector<64x512xf32> to vector<8x512xf32>
    %223 = arith.truncf %220 : vector<8x128xf32> to vector<8x128xbf16>
    %cst_37 = arith.constant dense<0.000000e+00> : vector<8x512xf32>
    %224 = tpu.matmul %223, %9, %cst_37 {dimension_numbers = #tpu.dot_dimension_numbers<[1], [0], [0], [1], [0, 0, 1, 1], [], []>} : vector<8x128xbf16>, vector<128x512xbf16>, vector<8x512xf32> -> vector<8x512xf32>
    %225 = arith.addf %222, %224 : vector<8x512xf32>
    %226 = vector.extract_strided_slice %225 {offsets = [0, 0], sizes = [8, 128], strides = [1, 1]} : vector<8x512xf32> to vector<8x128xf32>
    %227 = arith.negf %226 : vector<8x128xf32>
    %228 = math.exp %227 : vector<8x128xf32>
    %cst_38 = arith.constant 1.000000e+00 : f32
    %229 = vector.broadcast %cst_38 : f32 to vector<8x128xf32>
    %230 = arith.addf %229, %228 : vector<8x128xf32>
    %231 = arith.divf %229, %230 : vector<8x128xf32>
    %232 = vector.extract_strided_slice %225 {offsets = [0, 128], sizes = [8, 128], strides = [1, 1]} : vector<8x512xf32> to vector<8x128xf32>
    %233 = arith.negf %232 : vector<8x128xf32>
    %234 = math.exp %233 : vector<8x128xf32>
    %cst_39 = arith.constant 1.000000e+00 : f32
    %235 = vector.broadcast %cst_39 : f32 to vector<8x128xf32>
    %236 = arith.addf %235, %234 : vector<8x128xf32>
    %237 = arith.divf %235, %236 : vector<8x128xf32>
    %238 = vector.extract_strided_slice %225 {offsets = [0, 256], sizes = [8, 128], strides = [1, 1]} : vector<8x512xf32> to vector<8x128xf32>
    %239 = math.tanh %238 : vector<8x128xf32>
    %240 = vector.extract_strided_slice %225 {offsets = [0, 384], sizes = [8, 128], strides = [1, 1]} : vector<8x512xf32> to vector<8x128xf32>
    %241 = arith.negf %240 : vector<8x128xf32>
    %242 = math.exp %241 : vector<8x128xf32>
    %cst_40 = arith.constant 1.000000e+00 : f32
    %243 = vector.broadcast %cst_40 : f32 to vector<8x128xf32>
    %244 = arith.addf %243, %242 : vector<8x128xf32>
    %245 = arith.divf %243, %244 : vector<8x128xf32>
    %246 = arith.mulf %237, %218 : vector<8x128xf32>
    %247 = arith.mulf %231, %239 : vector<8x128xf32>
    %248 = arith.addf %246, %247 : vector<8x128xf32>
    %249 = math.tanh %248 : vector<8x128xf32>
    %250 = arith.mulf %245, %249 : vector<8x128xf32>
    %251 = vector.extract_strided_slice %250 {offsets = [7, 0], sizes = [1, 128], strides = [1, 1]} : vector<8x128xf32> to vector<1x128xf32>
    %252 = tpu.concatenate %41, %71, %101, %131, %161, %191, %221, %251 in 0 : vector<1x128xf32>, vector<1x128xf32>, vector<1x128xf32>, vector<1x128xf32>, vector<1x128xf32>, vector<1x128xf32>, vector<1x128xf32>, vector<1x128xf32> -> vector<8x128xf32>
    %c0_41 = arith.constant 0 : index
    %c0_42 = arith.constant 0 : index
    %253 = vector.load %arg4[%c0_41, %c0_42] : memref<1x128xf32, #tpu.memory_space<vmem>>, vector<1x128xf32>
    %254 = vector.broadcast %253 : vector<1x128xf32> to vector<8x128xf32>
    %255 = arith.mulf %252, %254 : vector<8x128xf32>
    %cst_43 = arith.constant dense<0.000000e+00> : vector<8xf32>
    %256 = vector.multi_reduction <add>, %255, %cst_43 [1] : vector<8x128xf32> to vector<8xf32>
    %257 = vector.shape_cast %256 : vector<8xf32> to vector<8x1xf32>
    %c0_44 = arith.constant 0 : index
    %c0_45 = arith.constant 0 : index
    %258 = vector.load %arg5[%c0_44, %c0_45] : memref<1x1xf32, #tpu.memory_space<vmem>>, vector<1x1xf32>
    %259 = vector.broadcast %258 : vector<1x1xf32> to vector<8x1xf32>
    %260 = arith.addf %257, %259 : vector<8x1xf32>
    %261 = arith.negf %260 : vector<8x1xf32>
    %262 = math.exp %261 : vector<8x1xf32>
    %cst_46 = arith.constant 1.000000e+00 : f32
    %263 = vector.broadcast %cst_46 : f32 to vector<8x1xf32>
    %264 = arith.addf %263, %262 : vector<8x1xf32>
    %265 = arith.divf %263, %264 : vector<8x1xf32>
    %c0_47 = arith.constant 0 : index
    %c0_48 = arith.constant 0 : index
    %266 = vector.load %arg6[%c0_47, %c0_48] : memref<8x1xf32, #tpu.memory_space<vmem>>, vector<8x1xf32>
    tpu.vector_store %arg6[%c0_47, %c0_48], %265 {strides = array<i32>} : memref<8x1xf32, #tpu.memory_space<vmem>>, vector<8x1xf32>,
    return
  }
}

</mosaic_0001>

<bundles_post_ra>
// kernel: tpu_custom_call.1
= control target key start
LH: loop header
LB: loop body
LE: loop exit
PB: predicated region body
PF: predicated region fallthrough
CT: control target
= control target key end

     0   :  { %s2137_s0 = inlined_call_operand.vmem [shape: f32[64,16], index: 0, kind: input, shape index: {}]   ;;  %s2138_s1 = inlined_call_operand.vmem [shape: f32[16,512], index: 1, kind: input, shape index: {}]   ;;  %s2139_s2 = inlined_call_operand.hbm [shape: f32[128,512], index: 2, kind: input, shape index: {}]   ;;  %s2140_s3 = inlined_call_operand.vmem [shape: f32[1,512], index: 3, kind: input, shape index: {}]   ;;  %s2141_s4 = inlined_call_operand.vmem [shape: f32[1,128], index: 4, kind: input, shape index: {}]   ;;  %s2142_s5 = inlined_call_operand.<no memory space> [shape: f32[1,1], index: 5, kind: input, shape index: {}]   ;;  %s2143_s6 = inlined_call_operand.vmem [shape: f32[8,1], index: 6, kind: output, shape index: {}]  }
   0x1   :  { %v11_v0 = vstv %s2142_s5 }
   0x2   :  { %12 = vst [vmem:[#allocation2] sm:$0x1] %v11_v0 }
   0x3   :  { %13 = vsyncpa [#allocation4], 0  ;;  %s22_s25 = sshll.u32 %s2139_s2, 4  ;;  %s1538_s26 = smov [#allocation3]   ;;  %s23_s25 = int_to_ptr.hbm [resolvable:$true] %s22_s25 }
   0x4   :  { %s24_s27 = sshll.u32 %s1538_s26, 4  ;;  %s1539_s28 = smov 512   ;;  %s25_s27 = int_to_ptr.vmem [resolvable:$true] %s24_s27 }
   0x5   :  { %s1540_s29 = smov 32  }
   0x6   :  { %30 = dma.hbm_to_vmem [thread:$0]  %s23_s25, 8192, %s25_s27, [#allocation4], %s1539_s28, %s1539_s28, %s1540_s29  }
   0x7   :  { %1536 = dma.done.wait [#allocation4], 8192  }
   0x8   :  { %1537 = vsyncadd [#allocation4], 4294959104  ;;  %v54_v1 = vld [vmem:[%s2138_s1] sm:$0xff]  ;;  %v55_v3 = vld [vmem:[%s2138_s1 + $0x8] sm:$0xff]  ;;  %vm76_vm0 = vcmask 130048  }
   0x9   :  { %v58_v2 = vld [vmem:[%s2138_s1 + $0x20] sm:$0xff]  ;;  %v59_v5 = vld [vmem:[%s2138_s1 + $0x28] sm:$0xff]  ;;  %v56_v6 = vld [vmem:[%s2138_s1 + $0x10] sm:$0xff] }
   0xa   :  { %v62_v4 = vpack.c.bf16 %v58_v2, %v54_v1  ;;  %v60_v7 = vld [vmem:[%s2138_s1 + $0x30] sm:$0xff]  ;;  %v63_v8 = vpack.c.bf16 %v59_v5, %v55_v3  ;;  %v57_v10 = vld [vmem:[%s2138_s1 + $0x18] sm:$0xff]  ;;  %v42_v12 = vld [vmem:[%s2137_s0] sm:$0xff] }
   0xb   :  { %v64_v9 = vpack.c.bf16 %v60_v7, %v56_v6  ;;  %v61_v11 = vld [vmem:[%s2138_s1 + $0x38] sm:$0xff]  ;;  %v43_v14 = vld [vmem:[%s2137_s0 + $0x8] sm:$0xff]  ;;  %v44_v58 = vld [vmem:[%s2137_s0 + $0x10] sm:$0xff] }
   0xc   :  { %96 = vmatpush.bf16.msra.mxu0 %v62_v4  ;;  %v65_v13 = vpack.c.bf16 %v61_v11, %v57_v10  ;;  %v261_v15 = vld [vmem:[#allocation3 + $0x1c0] sm:$0xff]  ;;  %125 = vmatpush.bf16.msra.mxu1 %v63_v8  ;;  %v50_v17 = vpack.c.bf16 %v43_v14, %v42_v12  ;;  %v262_v19 = vld [vmem:[#allocation3 + $0x1c8] sm:$0xff]  ;;  %v264_v21 = vld [vmem:[#allocation3 + $0x1d8] sm:$0xff] }
   0xd   :  { %v265_v16 = vld [vmem:[#allocation3 + $0x1e0] sm:$0xff]  ;;  %154 = vmatpush.bf16.msra.mxu2 %v64_v9  ;;  %v266_v20 = vld [vmem:[#allocation3 + $0x1e8] sm:$0xff]  ;;  %v268_v23 = vld [vmem:[#allocation3 + $0x1f8] sm:$0xff] }
   0xe   :  { %v1613_v18 = vpack.c.bf16 %v265_v16, %v261_v15  ;;  %183 = vmatpush.bf16.msra.mxu3 %v65_v13  ;;  %v1615_v22 = vpack.c.bf16 %v266_v20, %v262_v19  ;;  %v253_v24 = vld [vmem:[#allocation3 + $0x180] sm:$0xff]  ;;  %v1618_v26 = vpack.c.bf16 %v268_v23, %v264_v21  ;;  %v254_v27 = vld [vmem:[#allocation3 + $0x188] sm:$0xff]  ;;  %v256_v29 = vld [vmem:[#allocation3 + $0x198] sm:$0xff] }
   0xf   :  { %v257_v25 = vld [vmem:[#allocation3 + $0x1a0] sm:$0xff]  ;;  %1333 = vmatmul.msk.bf16.vlgmr.msra.gmra.mxu0 %vm76_vm0, %v50_v17  ;;  %v258_v28 = vld [vmem:[#allocation3 + $0x1a8] sm:$0xff]  ;;  %1337 = vmatmul.msk.bf16.vlgmr.msra.gmra.mxu1 %vm76_vm0, %v50_v17  ;;  %v260_v30 = vld [vmem:[#allocation3 + $0x1b8] sm:$0xff] }
  0x10   :  { %1341 = vmatmul.msk.bf16.vlgmr.msra.gmra.mxu2 %vm76_vm0, %v50_v17  ;;  %v263_v31 = vld [vmem:[#allocation3 + $0x1d0] sm:$0xff]  ;;  %301 = vmatpush.bf16.msrb.mxu0 %v1613_v18  ;;  %v1624_v33 = vpack.c.bf16 %v257_v25, %v253_v24  ;;  %v245_v35 = vld [vmem:[#allocation3 + $0x140] sm:$0xff]  ;;  %v1630_v36 = vpack.c.bf16 %v258_v28, %v254_v27  ;;  %v1632_v37 = vpack.c.bf16 %v260_v30, %v256_v29  ;;  %v246_v39 = vld [vmem:[#allocation3 + $0x148] sm:$0xff] }
  0x11   :  { %v267_v32 = vld [vmem:[#allocation3 + $0x1f0] sm:$0xff]  ;;  %1345 = vmatmul.msk.bf16.vlgmr.msra.gmra.mxu3 %vm76_vm0, %v50_v17  ;;  %314 = vmatpush.bf16.msrb.mxu1 %v1615_v22  ;;  %v249_v38 = vld [vmem:[#allocation3 + $0x160] sm:$0xff]  ;;  %v250_v40 = vld [vmem:[#allocation3 + $0x168] sm:$0xff] }
  0x12   :  { %v1626_v34 = vpack.c.bf16 %v267_v32, %v263_v31  ;;  %340 = vmatpush.bf16.msrb.mxu3 %v1618_v26  ;;  %v248_v41 = vld [vmem:[#allocation3 + $0x158] sm:$0xff]  ;;  %v255_v43 = vld [vmem:[#allocation3 + $0x190] sm:$0xff]  ;;  %v1636_v45 = vpack.c.bf16 %v249_v38, %v245_v35  ;;  %v237_v47 = vld [vmem:[#allocation3 + $0x100] sm:$0xff]  ;;  %v1642_v49 = vpack.c.bf16 %v250_v40, %v246_v39 }
  0x13   :  { %v252_v42 = vld [vmem:[#allocation3 + $0x178] sm:$0xff]  ;;  %v259_v44 = vld [vmem:[#allocation3 + $0x1b0] sm:$0xff]  ;;  %v241_v48 = vld [vmem:[#allocation3 + $0x120] sm:$0xff] }
  0x14   :  { %327 = vmatpush.bf16.msrb.mxu2 %v1626_v34  ;;  %302 = vmatpush.bf16.msrb.mxu0 %v1624_v33  ;;  %v1638_v46 = vpack.c.bf16 %v259_v44, %v255_v43  ;;  %v1644_v50 = vpack.c.bf16 %v252_v42, %v248_v41  ;;  %v238_v51 = vld [vmem:[#allocation3 + $0x108] sm:$0xff]  ;;  %v247_v52 = vld [vmem:[#allocation3 + $0x150] sm:$0xff]  ;;  %v240_v55 = vld [vmem:[#allocation3 + $0x118] sm:$0xff]  ;;  %v1656_v60 = vpack.c.bf16 %v241_v48, %v237_v47 }
  0x15   :  { %315 = vmatpush.bf16.msrb.mxu1 %v1630_v36  ;;  %v251_v53 = vld [vmem:[#allocation3 + $0x170] sm:$0xff]  ;;  %v242_v54 = vld [vmem:[#allocation3 + $0x128] sm:$0xff]  ;;  %v244_v56 = vld [vmem:[#allocation3 + $0x138] sm:$0xff] }
  0x16   :  { %341 = vmatpush.bf16.msrb.mxu3 %v1632_v37  ;;  %v1647_v57 = vpack.c.bf16 %v251_v53, %v247_v52  ;;  %v45_v59 = vld [vmem:[%s2137_s0 + $0x18] sm:$0xff]  ;;  %v229_v61 = vld [vmem:[#allocation3 + $0xc0] sm:$0xff]  ;;  %v1660_v63 = vpack.c.bf16 %v242_v54, %v238_v51  ;;  %v1662_v0 = vpack.c.bf16 %v244_v56, %v240_v55  ;;  %v230_v2 = vld [vmem:[#allocation3 + $0xc8] sm:$0xff] }
  0x17   :  { %v239_v62 = vld [vmem:[#allocation3 + $0x110] sm:$0xff]  ;;  %v233_v1 = vld [vmem:[#allocation3 + $0xe0] sm:$0xff]  ;;  %v51_v4 = vpack.c.bf16 %v45_v59, %v44_v58  ;;  %v234_v5 = vld [vmem:[#allocation3 + $0xe8] sm:$0xff] }
  0x18   :  { %328 = vmatpush.bf16.msrb.mxu2 %v1638_v46  ;;  %303 = vmatpush.bf16.msrb.mxu0 %v1636_v45  ;;  %v243_v3 = vld [vmem:[#allocation3 + $0x130] sm:$0xff]  ;;  %v232_v6 = vld [vmem:[#allocation3 + $0xd8] sm:$0xff]  ;;  %v1668_v11 = vpack.c.bf16 %v233_v1, %v229_v61  ;;  %v221_v12 = vld [vmem:[#allocation3 + $0x80] sm:$0xff]  ;;  %v1672_v13 = vpack.c.bf16 %v234_v5, %v230_v2 }
  0x19   :  { %316 = vmatpush.bf16.msrb.mxu1 %v1642_v49  ;;  %v236_v7 = vld [vmem:[#allocation3 + $0xf8] sm:$0xff]  ;;  %v1665_v8 = vpack.c.bf16 %v243_v3, %v239_v62  ;;  %v231_v9 = vld [vmem:[#allocation3 + $0xd0] sm:$0xff]  ;;  %v225_v15 = vld [vmem:[#allocation3 + $0xa0] sm:$0xff] }
  0x1a   :  { %342 = vmatpush.bf16.msrb.mxu3 %v1644_v50  ;;  %v235_v10 = vld [vmem:[#allocation3 + $0xf0] sm:$0xff]  ;;  %v1674_v14 = vpack.c.bf16 %v236_v7, %v232_v6  ;;  %v222_v16 = vld [vmem:[#allocation3 + $0x88] sm:$0xff]  ;;  %v224_v19 = vld [vmem:[#allocation3 + $0x98] sm:$0xff]  ;;  %v1684_v23 = vpack.c.bf16 %v225_v15, %v221_v12 }
  0x1b   :  { %v226_v17 = vld [vmem:[#allocation3 + $0xa8] sm:$0xff]  ;;  %v228_v20 = vld [vmem:[#allocation3 + $0xb8] sm:$0xff]  ;;  %v1678_v21 = vpack.c.bf16 %v235_v10, %v231_v9  ;;  %v213_v24 = vld [vmem:[#allocation3 + $0x40] sm:$0xff]  ;;  %v1541_v9 = vmov 0  }
  0x1c   :  { %329 = vmatpush.bf16.msrb.mxu2 %v1647_v57  ;;  %304 = vmatpush.bf16.msrb.mxu0 %v1656_v60  ;;  %v217_v25 = vld [vmem:[#allocation3 + $0x60] sm:$0xff]  ;;  %v1688_v27 = vpack.c.bf16 %v226_v17, %v222_v16  ;;  %v1690_v28 = vpack.c.bf16 %v228_v20, %v224_v19  ;;  %v214_v29 = vld [vmem:[#allocation3 + $0x48] sm:$0xff]  ;;  %v223_v30 = vld [vmem:[#allocation3 + $0x90] sm:$0xff] }
  0x1d   :  { %317 = vmatpush.bf16.msrb.mxu1 %v1660_v63  ;;  %v227_v31 = vld [vmem:[#allocation3 + $0xb0] sm:$0xff]  ;;  %v218_v32 = vld [vmem:[#allocation3 + $0x68] sm:$0xff]  ;;  %v216_v38 = vld [vmem:[#allocation3 + $0x58] sm:$0xff]  ;;  %v1696_v40 = vpack.c.bf16 %v217_v25, %v213_v24 }
  0x1e   :  { %343 = vmatpush.bf16.msrb.mxu3 %v1662_v0  ;;  %v1693_v35 = vpack.c.bf16 %v227_v31, %v223_v30  ;;  %v220_v39 = vld [vmem:[#allocation3 + $0x78] sm:$0xff]  ;;  %v215_v41 = vld [vmem:[#allocation3 + $0x50] sm:$0xff]  ;;  %v1703_v44 = vpack.c.bf16 %v218_v32, %v214_v29  ;;  %v205_v48 = vld [vmem:[#allocation3] sm:$0xff] }
  0x1f   :  { %1334 = vmatmul.msk.bf16.gmra.mxu0 %vm76_vm0, %v51_v4  ;;  %1338 = vmatmul.msk.bf16.gmra.mxu1 %vm76_vm0, %v51_v4  ;;  %v219_v42 = vld [vmem:[#allocation3 + $0x70] sm:$0xff]  ;;  %v46_v43 = vld [vmem:[%s2137_s0 + $0x20] sm:$0xff]  ;;  %v1705_v47 = vpack.c.bf16 %v220_v39, %v216_v38  ;;  %v206_v52 = vld [vmem:[#allocation3 + $0x8] sm:$0xff] }
  0x20   :  { %330 = vmatpush.bf16.msrb.mxu2 %v1665_v8  ;;  %305 = vmatpush.bf16.msrb.mxu0 %v1668_v11  ;;  %v209_v51 = vld [vmem:[#allocation3 + $0x20] sm:$0xff]  ;;  %v210_v53 = vld [vmem:[#allocation3 + $0x28] sm:$0xff]  ;;  %v1708_v54 = vpack.c.bf16 %v219_v42, %v215_v41  ;;  %v208_v55 = vld [vmem:[#allocation3 + $0x18] sm:$0xff] }
  0x21   :  { %1342 = vmatmul.msk.bf16.gmra.mxu2 %vm76_vm0, %v51_v4  ;;  %1346 = vmatmul.msk.bf16.gmra.mxu3 %vm76_vm0, %v51_v4  ;;  %v212_v56 = vld [vmem:[#allocation3 + $0x38] sm:$0xff]  ;;  %v47_v58 = vld [vmem:[%s2137_s0 + $0x28] sm:$0xff]  ;;  %v207_v59 = vld [vmem:[#allocation3 + $0x10] sm:$0xff]  ;;  %v1714_v62 = vpack.c.bf16 %v209_v51, %v205_v48  ;;  %v1718_v1 = vpack.c.bf16 %v210_v53, %v206_v52 }
  0x22   :  { %318 = vmatpush.bf16.msrb.mxu1 %v1672_v13  ;;  %344 = vmatpush.bf16.msrb.mxu3 %v1674_v14  ;;  %v211_v61 = vld [vmem:[#allocation3 + $0x30] sm:$0xff]  ;;  %v1720_v2 = vpack.c.bf16 %v212_v56, %v208_v55  ;;  %v52_v3 = vpack.c.bf16 %v47_v58, %v46_v43  ;;  %v66_v15 = vld [vmem:[%s2140_s3] sm:$0xf] }
  0x23   :  { %v1723_v4 = vpack.c.bf16 %v211_v61, %v207_v59  ;;  %v48_v5 = vld [vmem:[%s2137_s0 + $0x30] sm:$0xff]  ;;  %v49_v6 = vld [vmem:[%s2137_s0 + $0x38] sm:$0xff]  ;;  %v68_v16 = vperm.slane %v66_v15, 0  ;;  %v69_v19 = vperm.slane %v66_v15, 1  ;;  %v1818_v31 = vperm.slane %v66_v15, 2 }
  0x24   :  { %331 = vmatpush.bf16.msrb.mxu2 %v1678_v21  ;;  %306 = vmatpush.bf16.msrb.mxu0 %v1684_v23  ;;  %v53_v7 = vpack.c.bf16 %v49_v6, %v48_v5  ;;  %v1820_v32 = vperm.slane %v66_v15, 3 }
  0x26   :  { %319 = vmatpush.bf16.msrb.mxu1 %v1688_v27  ;;  %345 = vmatpush.bf16.msrb.mxu3 %v1690_v28 }
  0x28   :  { %332 = vmatpush.bf16.msrb.mxu2 %v1693_v35  ;;  %307 = vmatpush.bf16.msrb.mxu0 %v1696_v40 }
  0x2a   :  { %320 = vmatpush.bf16.msrb.mxu1 %v1703_v44  ;;  %346 = vmatpush.bf16.msrb.mxu3 %v1705_v47 }
  0x2c   :  { %333 = vmatpush.bf16.msrb.mxu2 %v1708_v54  ;;  %308 = vmatpush.bf16.msrb.mxu0 %v1714_v62 }
  0x2e   :  { %321 = vmatpush.bf16.msrb.mxu1 %v1718_v1  ;;  %347 = vmatpush.bf16.msrb.mxu3 %v1720_v2 }
  0x2f   :  { %1335 = vmatmul.msk.bf16.gmra.mxu0 %vm76_vm0, %v52_v3  ;;  %1339 = vmatmul.msk.bf16.gmra.mxu1 %vm76_vm0, %v52_v3 }
  0x30   :  { %334 = vmatpush.bf16.msrb.mxu2 %v1723_v4  ;;  %421 = vmatpush.bf16.msra.mxu0 %v1613_v18 }
  0x31   :  { %1343 = vmatmul.msk.bf16.gmra.mxu2 %vm76_vm0, %v52_v3  ;;  %1347 = vmatmul.msk.bf16.gmra.mxu3 %vm76_vm0, %v52_v3 }
  0x32   :  { %434 = vmatpush.bf16.msra.mxu1 %v1615_v22  ;;  %460 = vmatpush.bf16.msra.mxu3 %v1618_v26 }
  0x34   :  { %447 = vmatpush.bf16.msra.mxu2 %v1626_v34  ;;  %422 = vmatpush.bf16.msra.mxu0 %v1624_v33 }
  0x36   :  { %435 = vmatpush.bf16.msra.mxu1 %v1630_v36  ;;  %461 = vmatpush.bf16.msra.mxu3 %v1632_v37 }
  0x38   :  { %448 = vmatpush.bf16.msra.mxu2 %v1638_v46  ;;  %423 = vmatpush.bf16.msra.mxu0 %v1636_v45 }
  0x3a   :  { %436 = vmatpush.bf16.msra.mxu1 %v1642_v49  ;;  %462 = vmatpush.bf16.msra.mxu3 %v1644_v50 }
  0x3c   :  { %449 = vmatpush.bf16.msra.mxu2 %v1647_v57  ;;  %424 = vmatpush.bf16.msra.mxu0 %v1656_v60 }
  0x3e   :  { %437 = vmatpush.bf16.msra.mxu1 %v1660_v63  ;;  %463 = vmatpush.bf16.msra.mxu3 %v1662_v0 }
  0x3f   :  { %1336 = vmatmul.msk.bf16.gmra.mxu0 %vm76_vm0, %v53_v7  ;;  %1340 = vmatmul.msk.bf16.gmra.mxu1 %vm76_vm0, %v53_v7 }
  0x40   :  { %450 = vmatpush.bf16.msra.mxu2 %v1665_v8  ;;  %425 = vmatpush.bf16.msra.mxu0 %v1668_v11 }
  0x41   :  { %1344 = vmatmul.msk.bf16.gmra.mxu2 %vm76_vm0, %v53_v7  ;;  %1348 = vmatmul.msk.bf16.gmra.mxu3 %vm76_vm0, %v53_v7 }
  0x42   :  { %438 = vmatpush.bf16.msra.mxu1 %v1672_v13  ;;  %464 = vmatpush.bf16.msra.mxu3 %v1674_v14 }
  0x44   :  { %451 = vmatpush.bf16.msra.mxu2 %v1678_v21  ;;  %426 = vmatpush.bf16.msra.mxu0 %v1684_v23 }
  0x46   :  { %439 = vmatpush.bf16.msra.mxu1 %v1688_v27  ;;  %465 = vmatpush.bf16.msra.mxu3 %v1690_v28 }
  0x48   :  { %452 = vmatpush.bf16.msra.mxu2 %v1693_v35  ;;  %427 = vmatpush.bf16.msra.mxu0 %v1696_v40 }
  0x4a   :  { %440 = vmatpush.bf16.msra.mxu1 %v1703_v44  ;;  %466 = vmatpush.bf16.msra.mxu3 %v1705_v47 }
  0x4c   :  { %453 = vmatpush.bf16.msra.mxu2 %v1708_v54  ;;  %428 = vmatpush.bf16.msra.mxu0 %v1714_v62 }
  0x4e   :  { %441 = vmatpush.bf16.msra.mxu1 %v1718_v1  ;;  %467 = vmatpush.bf16.msra.mxu3 %v1720_v2 }
  0x4f   :  { %309 = vmatmul.bf16.vlgmr.msrb.gmra.mxu0 %v1541_v9  ;;  %322 = vmatmul.bf16.vlgmr.msrb.gmra.mxu1 %v1541_v9 }
  0x50   :  { %454 = vmatpush.bf16.msra.mxu2 %v1723_v4  ;;  %541 = vmatpush.bf16.msrb.mxu0 %v1613_v18 }
  0x51   :  { %335 = vmatmul.bf16.vlgmr.msrb.gmra.mxu2 %v1541_v9  ;;  %348 = vmatmul.bf16.vlgmr.msrb.gmra.mxu3 %v1541_v9 }
  0x52   :  { %554 = vmatpush.bf16.msrb.mxu1 %v1615_v22  ;;  %580 = vmatpush.bf16.msrb.mxu3 %v1618_v26 }
  0x54   :  { %567 = vmatpush.bf16.msrb.mxu2 %v1626_v34  ;;  %542 = vmatpush.bf16.msrb.mxu0 %v1624_v33 }
  0x56   :  { %555 = vmatpush.bf16.msrb.mxu1 %v1630_v36  ;;  %581 = vmatpush.bf16.msrb.mxu3 %v1632_v37 }
  0x58   :  { %568 = vmatpush.bf16.msrb.mxu2 %v1638_v46  ;;  %543 = vmatpush.bf16.msrb.mxu0 %v1636_v45 }
  0x5a   :  { %556 = vmatpush.bf16.msrb.mxu1 %v1642_v49  ;;  %582 = vmatpush.bf16.msrb.mxu3 %v1644_v50 }
  0x5c   :  { %569 = vmatpush.bf16.msrb.mxu2 %v1647_v57  ;;  %544 = vmatpush.bf16.msrb.mxu0 %v1656_v60 }
  0x5e   :  { %557 = vmatpush.bf16.msrb.mxu1 %v1660_v63  ;;  %583 = vmatpush.bf16.msrb.mxu3 %v1662_v0 }
  0x60   :  { %570 = vmatpush.bf16.msrb.mxu2 %v1665_v8  ;;  %545 = vmatpush.bf16.msrb.mxu0 %v1668_v11 }
  0x62   :  { %558 = vmatpush.bf16.msrb.mxu1 %v1672_v13  ;;  %584 = vmatpush.bf16.msrb.mxu3 %v1674_v14 }
  0x64   :  { %571 = vmatpush.bf16.msrb.mxu2 %v1678_v21  ;;  %546 = vmatpush.bf16.msrb.mxu0 %v1684_v23 }
  0x66   :  { %559 = vmatpush.bf16.msrb.mxu1 %v1688_v27  ;;  %585 = vmatpush.bf16.msrb.mxu3 %v1690_v28 }
  0x68   :  { %572 = vmatpush.bf16.msrb.mxu2 %v1693_v35  ;;  %547 = vmatpush.bf16.msrb.mxu0 %v1696_v40 }
  0x6a   :  { %560 = vmatpush.bf16.msrb.mxu1 %v1703_v44  ;;  %586 = vmatpush.bf16.msrb.mxu3 %v1705_v47 }
  0x6c   :  { %573 = vmatpush.bf16.msrb.mxu2 %v1708_v54  ;;  %548 = vmatpush.bf16.msrb.mxu0 %v1714_v62 }
  0x6e   :  { %561 = vmatpush.bf16.msrb.mxu1 %v1718_v1  ;;  %587 = vmatpush.bf16.msrb.mxu3 %v1720_v2 }
  0x70   :  { %574 = vmatpush.bf16.msrb.mxu2 %v1723_v4 }
  0x8c   :  { %v98_v10 = vpop.f32.mrf.mxu0  ;;  %v127_v12 = vpop.f32.mrf.mxu1 }
  0x93   :  { %v1810_v17 = vpop.f32.mrf.mxu2 }
  0x94   :  { %v1812_v20 = vpop.f32.mrf.mxu3  ;;  %v100_v24 = vpop.f32.mrf.mxu0 }
  0x95   :  { %v1814_v25 = vadd.f32 %v100_v24, %v68_v16  ;;  %v129_v29 = vpop.f32.mrf.mxu1 }
  0x96   :  { %v1816_v30 = vadd.f32 %v129_v29, %v69_v19 }
  0x9b   :  { %v158_v38 = vpop.f32.mrf.mxu2 }
  0x9c   :  { %v1823_v39 = vadd.f32 %v158_v38, %v1818_v31  ;;  %v187_v41 = vpop.f32.mrf.mxu3  ;;  %v103_v42 = vpop.f32.mrf.mxu0 }
  0x9d   :  { %v1826_v43 = vadd.f32 %v187_v41, %v1820_v32  ;;  %v1828_v48 = vadd.f32 %v103_v42, %v68_v16  ;;  %v132_v51 = vpop.f32.mrf.mxu1 }
  0x9e   :  { %v1830_v52 = vadd.f32 %v132_v51, %v69_v19 }
  0xa4   :  { %v161_v53 = vpop.f32.mrf.mxu2  ;;  %v190_v56 = vpop.f32.mrf.mxu3 }
  0xa5   :  { %v1833_v55 = vadd.f32 %v161_v53, %v1818_v31  ;;  %v105_v58 = vpop.f32.mrf.mxu0  ;;  %v1836_v59 = vadd.f32 %v190_v56, %v1820_v32  ;;  %v134_v3 = vpop.f32.mrf.mxu1 }
  0xa6   :  { %v1838_v61 = vadd.f32 %v105_v58, %v68_v16  ;;  %v1840_v5 = vadd.f32 %v134_v3, %v69_v19 }
  0xa7   :  { %2144 = vst [vmem:[#allocation6_spill] sm:$0xff] %v1833_v55 }
  0xa8   :  { %2145 = vst [vmem:[#allocation7_spill] sm:$0xff] %v1838_v61 }
  0xa9   :  { %2146 = vst [vmem:[#allocation8_spill] sm:$0xff] %v1840_v5 }
  0xac   :  { %v163_v6 = vpop.f32.mrf.mxu2  ;;  %v192_v9 = vpop.f32.mrf.mxu3 }
  0xad   :  { %v1843_v7 = vadd.f32 %v163_v6, %v1818_v31  ;;  %v108_v15 = vpop.f32.mrf.mxu0  ;;  %v1846_v24 = vadd.f32 %v192_v9, %v1820_v32  ;;  %v137_v38 = vpop.f32.mrf.mxu1 }
  0xae   :  { %v1848_v29 = vadd.f32 %v108_v15, %v68_v16  ;;  %v1850_v41 = vadd.f32 %v137_v38, %v69_v19 }
  0xaf   :  { %2147 = vst [vmem:[#allocation9_spill] sm:$0xff] %v1843_v7 }
  0xb0   :  { %2148 = vst [vmem:[#allocation10_spill] sm:$0xff] %v1846_v24 }
  0xb1   :  { %2149 = vst [vmem:[#allocation11_spill] sm:$0xff] %v1848_v29 }
  0xb2   :  { %2150 = vst [vmem:[#allocation12_spill] sm:$0xff] %v1850_v41 }
  0xb4   :  { %v166_v42 = vpop.f32.mrf.mxu2  ;;  %v195_v53 = vpop.f32.mrf.mxu3 }
  0xb5   :  { %v1853_v51 = vadd.f32 %v166_v42, %v1818_v31  ;;  %v110_v56 = vpop.f32.mrf.mxu0  ;;  %v1856_v58 = vadd.f32 %v195_v53, %v1820_v32  ;;  %v139_v6 = vpop.f32.mrf.mxu1 }
  0xb6   :  { %v1858_v3 = vadd.f32 %v110_v56, %v68_v16  ;;  %v1860_v7 = vadd.f32 %v139_v6, %v69_v19 }
  0xb7   :  { %2151 = vst [vmem:[#allocation13_spill] sm:$0xff] %v1853_v51 }
  0xb8   :  { %2152 = vst [vmem:[#allocation14_spill] sm:$0xff] %v1856_v58 }
  0xb9   :  { %2153 = vst [vmem:[#allocation15_spill] sm:$0xff] %v1858_v3 }
  0xba   :  { %2154 = vst [vmem:[#allocation16_spill] sm:$0xff] %v1860_v7 }
  0xbc   :  { %v168_v9 = vpop.f32.mrf.mxu2  ;;  %v197_v38 = vpop.f32.mrf.mxu3 }
  0xbd   :  { %v1863_v15 = vadd.f32 %v168_v9, %v1818_v31  ;;  %v113_v41 = vpop.f32.mrf.mxu0  ;;  %v1866_v29 = vadd.f32 %v197_v38, %v1820_v32  ;;  %v142_v51 = vpop.f32.mrf.mxu1  ;;  %v99_v38 = vadd.f32 %v98_v10, %v68_v16  ;;  %v186_v10 = vadd.f32 %v1812_v20, %v1820_v32 }
  0xbe   :  { %v1868_v42 = vadd.f32 %v113_v41, %v68_v16  ;;  %v1870_v24 = vadd.f32 %v142_v51, %v69_v19 }
  0xbf   :  { %2155 = vst [vmem:[#allocation17_spill] sm:$0xff] %v1863_v15 }
  0xc0   :  { %2156 = vst [vmem:[#allocation18_spill] sm:$0xff] %v1866_v29 }
  0xc1   :  { %2157 = vst [vmem:[#allocation19_spill] sm:$0xff] %v1868_v42  ;;  %v128_v42 = vadd.f32 %v127_v12, %v69_v19 }
  0xc2   :  { %2158 = vst [vmem:[#allocation20_spill] sm:$0xff] %v1870_v24 }
  0xc4   :  { %v171_v53 = vpop.f32.mrf.mxu2  ;;  %v200_v6 = vpop.f32.mrf.mxu3 }
  0xc5   :  { %v1873_v56 = vadd.f32 %v171_v53, %v1818_v31  ;;  %v115_v7 = vpop.f32.mrf.mxu0  ;;  %v1876_v3 = vadd.f32 %v200_v6, %v1820_v32  ;;  %v144_v15 = vpop.f32.mrf.mxu1 }
  0xc6   :  { %v1878_v9 = vadd.f32 %v115_v7, %v68_v16  ;;  %v1880_v58 = vadd.f32 %v144_v15, %v69_v19 }
  0xc7   :  { %2159 = vst [vmem:[#allocation21_spill] sm:$0xff] %v1873_v56 }
  0xc8   :  { %2160 = vst [vmem:[#allocation22_spill] sm:$0xff] %v1876_v3 }
  0xc9   :  { %2161 = vst [vmem:[#allocation23_spill] sm:$0xff] %v1878_v9 }
  0xca   :  { %2162 = vst [vmem:[#allocation24_spill] sm:$0xff] %v1880_v58 }
  0xcc   :  { %v173_v41 = vpop.f32.mrf.mxu2  ;;  %v202_v24 = vpop.f32.mrf.mxu3 }
  0xcd   :  { %v1883_v51 = vadd.f32 %v173_v41, %v1818_v31  ;;  %v310_v29 = vpop.f32.mrf.mxu0  ;;  %v1886_v53 = vadd.f32 %v202_v24, %v1820_v32  ;;  %v323_v5 = vpop.f32.mrf.mxu1 }
  0xce   :  { %v353_v56 = vadd.f32 %v310_v29, %v99_v38  ;;  %v354_v6 = vadd.f32 %v323_v5, %v128_v42 }
  0xcf   :  { %2163 = vst [vmem:[#allocation25_spill] sm:$0xff] %v1883_v51 }
  0xd0   :  { %2164 = vst [vmem:[#allocation26_spill] sm:$0xff] %v1886_v53  ;;  %v1349_v3 = vmul.f32 -1.442695, %v353_v56  ;;  %v1350_v7 = vmul.f32 -1.442695, %v354_v6 }
  0xd2   :  { %1380 = vpow2.f32 %v1349_v3  ;;  %v157_v3 = vadd.f32 %v1810_v17, %v1818_v31 }
  0xd3   :  { %1382 = vpow2.f32 %v1350_v7 }
  0xd4   :  { %v336_v16 = vpop.f32.mrf.mxu2  ;;  %v349_v12 = vpop.f32.mrf.mxu3 }
  0xd5   :  { %v312_v19 = vpop.f32.mrf.mxu0  ;;  %v356_v15 = vadd.f32 %v349_v12, %v186_v10  ;;  %v325_v41 = vpop.f32.mrf.mxu1  ;;  %v355_v32 = vadd.f32 %v336_v16, %v157_v3 }
  0xd7   :  { %v1351_v58 = vmul.f32 -1.442695, %v356_v15 }
  0xd8   :  { %v1381_v51 = vpop.eup %1380 }
  0xd9   :  { %v1383_v9 = vpop.eup %1382  ;;  %v360_v24 = vadd.f32 1.0, %v1381_v51  ;;  %1384 = vpow2.f32 %v1351_v58 }
  0xda   :  { %v379_v53 = vadd.f32 1.0, %v1383_v9 }
  0xdb   :  { %1386 = vrcp.f32 %v360_v24  ;;  %v372_v51 = vand.u32 2147483648, %v360_v24  ;;  %v370_v19 = vand.u32 2147483647, %v360_v24  ;;  %vm366_vm3 = vweird.f32 %v360_v24 }
  0xdc   :  { %1388 = vrcp.f32 %v379_v53  ;;  %v338_v5 = vpop.f32.mrf.mxu2  ;;  %v351_v29 = vpop.f32.mrf.mxu3  ;;  %v391_v58 = vand.u32 2147483648, %v379_v53  ;;  %v389_v41 = vand.u32 2147483647, %v379_v53  ;;  %vm385_vm4 = vweird.f32 %v379_v53 }
  0xdd   :  { %v373_v16 = vor.u32 1.1754944e-38, %v372_v51  ;;  %vm371_vm6 = vcmp.eq.f32.partialorder %v370_v19, 8.507059e+37 }
  0xde   :  { %v392_v29 = vor.u32 1.1754944e-38, %v391_v58  ;;  %vm390_vm8 = vcmp.eq.f32.partialorder %v389_v41, 8.507059e+37 }
  0xdf   :  { %v1385_v42 = vpop.eup %1384 }
  0xe0   :  { %v399_v56 = vadd.f32 1.0, %v1385_v42 }
  0xe1   :  { %v1387_v20 = vpop.eup %1386 }
  0xe2   :  { %v1389_v38 = vpop.eup %1388  ;;  %v362_v6 = vmul.f32 %v1387_v20, %v360_v24  ;;  %1390 = vrcp.f32 %v399_v56  ;;  %vm367_vm1 = vweird.f32 %v1387_v20  ;;  %v411_v51 = vand.u32 2147483648, %v399_v56 }
  0xe3   :  { %v381_v7 = vmul.f32 %v1389_v38, %v379_v53  ;;  %1392 = vtanh.f32 %v355_v32  ;;  %vm386_vm2 = vweird.f32 %v1389_v38  ;;  %vm368_vm5 = vmor %vm366_vm3, %vm367_vm1  ;;  %vm405_vm10 = vweird.f32 %v399_v56 }
  0xe4   :  { %v363_v10 = vsub.f32 1.0, %v362_v6  ;;  %vm387_vm7 = vmor %vm385_vm4, %vm386_vm2  ;;  %v412_v19 = vor.u32 1.1754944e-38, %v411_v51 }
  0xe5   :  { %v382_v12 = vsub.f32 1.0, %v381_v7 }
  0xe6   :  { %v364_v9 = vmul.f32 %v1387_v20, %v363_v10 }
  0xe7   :  { %v383_v15 = vmul.f32 %v1389_v38, %v382_v12 }
  0xe8   :  { %v365_v17 = vadd.f32 %v1387_v20, %v364_v9  ;;  %v1391_v31 = vpop.eup %1390 }
  0xe9   :  { %v384_v5 = vadd.f32 %v1389_v38, %v383_v15  ;;  %v401_v42 = vmul.f32 %v1391_v31, %v399_v56  ;;  %v1393_v32 = vpop.eup %1392  ;;  %vm406_vm9 = vweird.f32 %v1391_v31 }
  0xea   :  { %v369_v3 = vsel %vm368_vm5, %v1387_v20, %v365_v17  ;;  %v409_v20 = vand.u32 2147483647, %v399_v56  ;;  %vm407_vm11 = vmor %vm405_vm10, %vm406_vm9  ;;  %vm1281_vm9 = vcmask 1040384  }
  0xeb   :  { %v374_v6 = vsel %vm371_vm6, %v373_v16, %v369_v3  ;;  %v388_v7 = vsel %vm387_vm7, %v1389_v38, %v384_v5  ;;  %v402_v61 = vsub.f32 1.0, %v401_v42 }
  0xec   :  { %v393_v10 = vsel %vm390_vm8, %v392_v29, %v388_v7  ;;  %v416_v12 = vmul.f32 %v1393_v32, %v374_v6  ;;  %vm410_vm12 = vcmp.eq.f32.partialorder %v409_v20, 8.507059e+37 }
  0xed   :  { %v415_v55 = vmul.f32 0.0, %v393_v10  ;;  %v403_v9 = vmul.f32 %v1391_v31, %v402_v61 }
  0xef   :  { %v1892_v24 = vadd.f32 %v416_v12, %v415_v55  ;;  %v404_v53 = vadd.f32 %v1391_v31, %v403_v9 }
  0xf1   :  { %1394 = vtanh.f32 %v1892_v24  ;;  %v408_v58 = vsel %vm407_vm11, %v1391_v31, %v404_v53 }
  0xf2   :  { %v413_v15 = vsel %vm410_vm12, %v412_v19, %v408_v58 }
  0xf7   :  { %v1395_v38 = vpop.eup %1394 }
  0xf8   :  { %v1895_v41 = vmul.f32 %v1395_v38, %v413_v15 }
  0xfa   :  { %v420_v61 = vpack.c.bf16 %v1895_v41, %v1895_v41 }
  0xfc   :  { %429 = vmatmul.bf16.vlgmr.msra.gmra.mxu0 %v420_v61  ;;  %442 = vmatmul.bf16.vlgmr.msra.gmra.mxu1 %v420_v61 }
  0xfd   :  { %455 = vmatmul.bf16.vlgmr.msra.gmra.mxu2 %v420_v61  ;;  %468 = vmatmul.bf16.vlgmr.msra.gmra.mxu3 %v420_v61 }
  0xfe   :  { %661 = vmatpush.bf16.msra.mxu0 %v1613_v18  ;;  %674 = vmatpush.bf16.msra.mxu1 %v1615_v22 }
  0xff   :  { %687 = vmatpush.bf16.msra.mxu2 %v1626_v34  ;;  %700 = vmatpush.bf16.msra.mxu3 %v1618_v26 }
 0x102   :  { %662 = vmatpush.bf16.msra.mxu0 %v1624_v33  ;;  %675 = vmatpush.bf16.msra.mxu1 %v1630_v36 }
 0x103   :  { %688 = vmatpush.bf16.msra.mxu2 %v1638_v46  ;;  %701 = vmatpush.bf16.msra.mxu3 %v1632_v37 }
 0x106   :  { %663 = vmatpush.bf16.msra.mxu0 %v1636_v45  ;;  %676 = vmatpush.bf16.msra.mxu1 %v1642_v49 }
 0x107   :  { %689 = vmatpush.bf16.msra.mxu2 %v1647_v57  ;;  %702 = vmatpush.bf16.msra.mxu3 %v1644_v50 }
 0x10a   :  { %664 = vmatpush.bf16.msra.mxu0 %v1656_v60  ;;  %677 = vmatpush.bf16.msra.mxu1 %v1660_v63 }
 0x10b   :  { %690 = vmatpush.bf16.msra.mxu2 %v1665_v8  ;;  %703 = vmatpush.bf16.msra.mxu3 %v1662_v0 }
 0x10e   :  { %665 = vmatpush.bf16.msra.mxu0 %v1668_v11  ;;  %678 = vmatpush.bf16.msra.mxu1 %v1672_v13 }
 0x10f   :  { %691 = vmatpush.bf16.msra.mxu2 %v1678_v21  ;;  %704 = vmatpush.bf16.msra.mxu3 %v1674_v14 }
 0x112   :  { %666 = vmatpush.bf16.msra.mxu0 %v1684_v23  ;;  %679 = vmatpush.bf16.msra.mxu1 %v1688_v27 }
 0x113   :  { %692 = vmatpush.bf16.msra.mxu2 %v1693_v35  ;;  %705 = vmatpush.bf16.msra.mxu3 %v1690_v28 }
 0x116   :  { %667 = vmatpush.bf16.msra.mxu0 %v1696_v40  ;;  %680 = vmatpush.bf16.msra.mxu1 %v1703_v44 }
 0x117   :  { %693 = vmatpush.bf16.msra.mxu2 %v1708_v54  ;;  %706 = vmatpush.bf16.msra.mxu3 %v1705_v47 }
 0x11a   :  { %668 = vmatpush.bf16.msra.mxu0 %v1714_v62  ;;  %681 = vmatpush.bf16.msra.mxu1 %v1718_v1 }
 0x11b   :  { %694 = vmatpush.bf16.msra.mxu2 %v1723_v4  ;;  %707 = vmatpush.bf16.msra.mxu3 %v1720_v2 }
 0x179   :  { %v430_v55 = vpop.f32.mrf.mxu0  ;;  %v443_v56 = vpop.f32.mrf.mxu1 }
 0x17a   :  { %v473_v17 = vadd.f32 %v430_v55, %v1814_v25  ;;  %v474_v31 = vadd.f32 %v443_v56, %v1816_v30 }
 0x17c   :  { %v1352_v16 = vmul.f32 -1.442695, %v473_v17  ;;  %v1353_v5 = vmul.f32 -1.442695, %v474_v31 }
 0x17e   :  { %1396 = vpow2.f32 %v1352_v16 }
 0x17f   :  { %1398 = vpow2.f32 %v1353_v5 }
 0x180   :  { %v456_v29 = vpop.f32.mrf.mxu2  ;;  %v469_v3 = vpop.f32.mrf.mxu3 }
 0x181   :  { %v476_v42 = vadd.f32 %v469_v3, %v1826_v43  ;;  %v432_v32 = vpop.f32.mrf.mxu0  ;;  %v445_v6 = vpop.f32.mrf.mxu1  ;;  %v475_v19 = vadd.f32 %v456_v29, %v1823_v39 }
 0x183   :  { %v1354_v7 = vmul.f32 -1.442695, %v476_v42 }
 0x184   :  { %v1397_v10 = vpop.eup %1396 }
 0x185   :  { %v1399_v12 = vpop.eup %1398  ;;  %v480_v9 = vadd.f32 1.0, %v1397_v10  ;;  %1400 = vpow2.f32 %v1354_v7 }
 0x186   :  { %v499_v53 = vadd.f32 1.0, %v1399_v12 }
 0x187   :  { %1402 = vrcp.f32 %v480_v9  ;;  %v492_v56 = vand.u32 2147483648, %v480_v9  ;;  %v490_v16 = vand.u32 2147483647, %v480_v9  ;;  %vm486_vm15 = vweird.f32 %v480_v9 }
 0x188   :  { %1404 = vrcp.f32 %v499_v53  ;;  %v458_v25 = vpop.f32.mrf.mxu2  ;;  %v471_v30 = vpop.f32.mrf.mxu3  ;;  %v511_v17 = vand.u32 2147483648, %v499_v53  ;;  %v509_v3 = vand.u32 2147483647, %v499_v53  ;;  %vm505_vm0 = vweird.f32 %v499_v53 }
 0x189   :  { %v493_v39 = vor.u32 1.1754944e-38, %v492_v56  ;;  %vm491_vm3 = vcmp.eq.f32.partialorder %v490_v16, 8.507059e+37 }
 0x18a   :  { %v512_v7 = vor.u32 1.1754944e-38, %v511_v17  ;;  %vm510_vm4 = vcmp.eq.f32.partialorder %v509_v3, 8.507059e+37 }
 0x18b   :  { %v1401_v51 = vpop.eup %1400 }
 0x18c   :  { %v519_v20 = vadd.f32 1.0, %v1401_v51 }
 0x18d   :  { %v1403_v58 = vpop.eup %1402 }
 0x18e   :  { %v1405_v38 = vpop.eup %1404  ;;  %v482_v15 = vmul.f32 %v1403_v58, %v480_v9  ;;  %1406 = vrcp.f32 %v519_v20  ;;  %vm487_vm13 = vweird.f32 %v1403_v58  ;;  %vm525_vm6 = vweird.f32 %v519_v20 }
 0x18f   :  { %v501_v43 = vmul.f32 %v1405_v38, %v499_v53  ;;  %1408 = vtanh.f32 %v475_v19  ;;  %vm506_vm14 = vweird.f32 %v1405_v38  ;;  %vm488_vm1 = vmor %vm486_vm15, %vm487_vm13 }
 0x190   :  { %v483_v61 = vsub.f32 1.0, %v482_v15  ;;  %vm507_vm2 = vmor %vm505_vm0, %vm506_vm14 }
 0x191   :  { %v502_v55 = vsub.f32 1.0, %v501_v43 }
 0x192   :  { %v484_v31 = vmul.f32 %v1403_v58, %v483_v61 }
 0x193   :  { %v503_v5 = vmul.f32 %v1405_v38, %v502_v55  ;;  %v531_v55 = vand.u32 2147483648, %v519_v20 }
 0x194   :  { %v1407_v42 = vpop.eup %1406  ;;  %v485_v32 = vadd.f32 %v1403_v58, %v484_v31 }
 0x195   :  { %v504_v29 = vadd.f32 %v1405_v38, %v503_v5  ;;  %v521_v6 = vmul.f32 %v1407_v42, %v519_v20  ;;  %v1409_v12 = vpop.eup %1408  ;;  %vm526_vm5 = vweird.f32 %v1407_v42  ;;  %v532_v17 = vor.u32 1.1754944e-38, %v531_v55 }
 0x196   :  { %v489_v10 = vsel %vm488_vm1, %v1403_v58, %v485_v32  ;;  %v529_v58 = vand.u32 2147483647, %v519_v20  ;;  %vm527_vm7 = vmor %vm525_vm6, %vm526_vm5  ;;  %vm1283_vm6 = vcmask 1041408  }
 0x197   :  { %v494_v25 = vsel %vm491_vm3, %v493_v39, %v489_v10  ;;  %v508_v30 = vsel %vm507_vm2, %v1405_v38, %v504_v29  ;;  %v522_v51 = vsub.f32 1.0, %v521_v6 }
 0x198   :  { %v513_v19 = vsel %vm510_vm4, %v512_v7, %v508_v30  ;;  %v536_v15 = vmul.f32 %v1409_v12, %v494_v25  ;;  %vm530_vm8 = vcmp.eq.f32.partialorder %v529_v58, 8.507059e+37 }
 0x199   :  { %v535_v43 = vmul.f32 %v513_v19, %v1892_v24  ;;  %v523_v61 = vmul.f32 %v1407_v42, %v522_v51  ;;  %v1261_v24 = vrot.slane %v1895_v41, 7 }
 0x19b   :  { %v1936_v9 = vadd.f32 %v536_v15, %v535_v43  ;;  %v524_v53 = vadd.f32 %v1407_v42, %v523_v61 }
 0x19d   :  { %1410 = vtanh.f32 %v1936_v9  ;;  %v528_v56 = vsel %vm527_vm7, %v1407_v42, %v524_v53 }
 0x19e   :  { %v533_v31 = vsel %vm530_vm8, %v532_v17, %v528_v56  ;;  %v2165_v56 = vld [vmem:[#allocation6_spill] sm:$0xff] }
 0x1a3   :  { %v1411_v38 = vpop.eup %1410 }
 0x1a4   :  { %v539_v16 = vmul.f32 %v1411_v38, %v533_v31 }
 0x1a6   :  { %v540_v5 = vpack.c.bf16 %v539_v16, %v539_v16  ;;  %v1264_v3 = vrot.slane %v539_v16, 6 }
 0x1a8   :  { %549 = vmatmul.bf16.vlgmr.msrb.gmra.mxu0 %v540_v5  ;;  %562 = vmatmul.bf16.vlgmr.msrb.gmra.mxu1 %v540_v5  ;;  %v1940_v32 = vsel %vm1281_vm9, %v1261_v24, %v1264_v3 }
 0x1a9   :  { %575 = vmatmul.bf16.vlgmr.msrb.gmra.mxu2 %v540_v5  ;;  %588 = vmatmul.bf16.vlgmr.msrb.gmra.mxu3 %v540_v5 }
 0x1aa   :  { %781 = vmatpush.bf16.msrb.mxu0 %v1613_v18  ;;  %794 = vmatpush.bf16.msrb.mxu1 %v1615_v22 }
 0x1ab   :  { %807 = vmatpush.bf16.msrb.mxu2 %v1626_v34  ;;  %820 = vmatpush.bf16.msrb.mxu3 %v1618_v26 }
 0x1ae   :  { %782 = vmatpush.bf16.msrb.mxu0 %v1624_v33  ;;  %795 = vmatpush.bf16.msrb.mxu1 %v1630_v36 }
 0x1af   :  { %808 = vmatpush.bf16.msrb.mxu2 %v1638_v46  ;;  %821 = vmatpush.bf16.msrb.mxu3 %v1632_v37 }
 0x1b2   :  { %783 = vmatpush.bf16.msrb.mxu0 %v1636_v45  ;;  %796 = vmatpush.bf16.msrb.mxu1 %v1642_v49 }
 0x1b3   :  { %809 = vmatpush.bf16.msrb.mxu2 %v1647_v57  ;;  %822 = vmatpush.bf16.msrb.mxu3 %v1644_v50 }
 0x1b6   :  { %784 = vmatpush.bf16.msrb.mxu0 %v1656_v60  ;;  %797 = vmatpush.bf16.msrb.mxu1 %v1660_v63 }
 0x1b7   :  { %810 = vmatpush.bf16.msrb.mxu2 %v1665_v8  ;;  %823 = vmatpush.bf16.msrb.mxu3 %v1662_v0 }
 0x1ba   :  { %785 = vmatpush.bf16.msrb.mxu0 %v1668_v11  ;;  %798 = vmatpush.bf16.msrb.mxu1 %v1672_v13 }
 0x1bb   :  { %811 = vmatpush.bf16.msrb.mxu2 %v1678_v21  ;;  %824 = vmatpush.bf16.msrb.mxu3 %v1674_v14 }
 0x1be   :  { %786 = vmatpush.bf16.msrb.mxu0 %v1684_v23  ;;  %799 = vmatpush.bf16.msrb.mxu1 %v1688_v27 }
 0x1bf   :  { %812 = vmatpush.bf16.msrb.mxu2 %v1693_v35  ;;  %825 = vmatpush.bf16.msrb.mxu3 %v1690_v28 }
 0x1c2   :  { %787 = vmatpush.bf16.msrb.mxu0 %v1696_v40  ;;  %800 = vmatpush.bf16.msrb.mxu1 %v1703_v44 }
 0x1c3   :  { %813 = vmatpush.bf16.msrb.mxu2 %v1708_v54  ;;  %826 = vmatpush.bf16.msrb.mxu3 %v1705_v47 }
 0x1c6   :  { %788 = vmatpush.bf16.msrb.mxu0 %v1714_v62  ;;  %801 = vmatpush.bf16.msrb.mxu1 %v1718_v1 }
 0x1c7   :  { %814 = vmatpush.bf16.msrb.mxu2 %v1723_v4  ;;  %827 = vmatpush.bf16.msrb.mxu3 %v1720_v2 }
 0x225   :  { %v550_v41 = vpop.f32.mrf.mxu0  ;;  %v563_v20 = vpop.f32.mrf.mxu1 }
 0x226   :  { %v593_v42 = vadd.f32 %v550_v41, %v1828_v48  ;;  %v594_v39 = vadd.f32 %v563_v20, %v1830_v52 }
 0x228   :  { %v1355_v29 = vmul.f32 -1.442695, %v593_v42  ;;  %v1356_v6 = vmul.f32 -1.442695, %v594_v39 }
 0x22a   :  { %1412 = vpow2.f32 %v1355_v29 }
 0x22b   :  { %1414 = vpow2.f32 %v1356_v6 }
 0x22c   :  { %v576_v7 = vpop.f32.mrf.mxu2  ;;  %v589_v10 = vpop.f32.mrf.mxu3 }
 0x22d   :  { %v596_v12 = vadd.f32 %v589_v10, %v1836_v59  ;;  %v552_v25 = vpop.f32.mrf.mxu0  ;;  %v565_v30 = vpop.f32.mrf.mxu1  ;;  %v595_v17 = vadd.f32 %v576_v7, %v2165_v56 }
 0x22f   :  { %v1357_v51 = vmul.f32 -1.442695, %v596_v12 }
 0x230   :  { %v1413_v19 = vpop.eup %1412 }
 0x231   :  { %v1415_v15 = vpop.eup %1414  ;;  %v600_v43 = vadd.f32 1.0, %v1413_v19  ;;  %1416 = vpow2.f32 %v1357_v51 }
 0x232   :  { %v619_v61 = vadd.f32 1.0, %v1415_v15 }
 0x233   :  { %1418 = vrcp.f32 %v600_v43  ;;  %v612_v5 = vand.u32 2147483648, %v600_v43  ;;  %v610_v20 = vand.u32 2147483647, %v600_v43  ;;  %vm606_vm12 = vweird.f32 %v600_v43 }
 0x234   :  { %1420 = vrcp.f32 %v619_v61  ;;  %v578_v48 = vpop.f32.mrf.mxu2  ;;  %v591_v52 = vpop.f32.mrf.mxu3  ;;  %v631_v3 = vand.u32 2147483648, %v619_v61  ;;  %v629_v39 = vand.u32 2147483647, %v619_v61  ;;  %vm625_vm13 = vweird.f32 %v619_v61 }
 0x235   :  { %v613_v7 = vor.u32 1.1754944e-38, %v612_v5  ;;  %vm611_vm0 = vcmp.eq.f32.partialorder %v610_v20, 8.507059e+37  ;;  %v2166_v20 = vld [vmem:[#allocation7_spill] sm:$0xff] }
 0x236   :  { %v632_v25 = vor.u32 1.1754944e-38, %v631_v3  ;;  %vm630_vm1 = vcmp.eq.f32.partialorder %v629_v39, 8.507059e+37  ;;  %v2167_v39 = vld [vmem:[#allocation8_spill] sm:$0xff] }
 0x237   :  { %v1417_v53 = vpop.eup %1416 }
 0x238   :  { %v639_v55 = vadd.f32 1.0, %v1417_v53 }
 0x239   :  { %v1419_v58 = vpop.eup %1418 }
 0x23a   :  { %v1421_v38 = vpop.eup %1420  ;;  %v602_v31 = vmul.f32 %v1419_v58, %v600_v43  ;;  %1422 = vrcp.f32 %v639_v55  ;;  %vm607_vm10 = vweird.f32 %v1419_v58  ;;  %vm645_vm3 = vweird.f32 %v639_v55 }
 0x23b   :  { %v621_v59 = vmul.f32 %v1421_v38, %v619_v61  ;;  %1424 = vtanh.f32 %v595_v17  ;;  %vm626_vm11 = vweird.f32 %v1421_v38  ;;  %vm608_vm14 = vmor %vm606_vm12, %vm607_vm10 }
 0x23c   :  { %v603_v16 = vsub.f32 1.0, %v602_v31  ;;  %vm627_vm15 = vmor %vm625_vm13, %vm626_vm11  ;;  %v651_v31 = vand.u32 2147483648, %v639_v55 }
 0x23d   :  { %v622_v24 = vsub.f32 1.0, %v621_v59 }
 0x23e   :  { %v604_v41 = vmul.f32 %v1419_v58, %v603_v16  ;;  %v652_v16 = vor.u32 1.1754944e-38, %v651_v31 }
 0x23f   :  { %v623_v42 = vmul.f32 %v1421_v38, %v622_v24 }
 0x240   :  { %v1423_v29 = vpop.eup %1422  ;;  %v605_v6 = vadd.f32 %v1419_v58, %v604_v41 }
 0x241   :  { %v624_v10 = vadd.f32 %v1421_v38, %v623_v42  ;;  %v641_v12 = vmul.f32 %v1423_v29, %v639_v55  ;;  %v1425_v51 = vpop.eup %1424  ;;  %vm646_vm2 = vweird.f32 %v1423_v29 }
 0x242   :  { %v609_v30 = vsel %vm608_vm14, %v1419_v58, %v605_v6  ;;  %v649_v58 = vand.u32 2147483647, %v639_v55  ;;  %vm647_vm4 = vmor %vm645_vm3, %vm646_vm2  ;;  %vm1285_vm3 = vcmask 1042432  }
 0x243   :  { %v614_v19 = vsel %vm611_vm0, %v613_v7, %v609_v30  ;;  %v628_v15 = vsel %vm627_vm15, %v1421_v38, %v624_v10  ;;  %v642_v48 = vsub.f32 1.0, %v641_v12 }
 0x244   :  { %v633_v52 = vsel %vm630_vm1, %v632_v25, %v628_v15  ;;  %v656_v53 = vmul.f32 %v1425_v51, %v614_v19  ;;  %vm650_vm5 = vcmp.eq.f32.partialorder %v649_v58, 8.507059e+37  ;;  %v2168_v25 = vld [vmem:[#allocation10_spill] sm:$0xff] }
 0x245   :  { %v655_v56 = vmul.f32 %v633_v52, %v1936_v9  ;;  %v643_v17 = vmul.f32 %v1423_v29, %v642_v48 }
 0x247   :  { %v1979_v43 = vadd.f32 %v656_v53, %v655_v56  ;;  %v644_v61 = vadd.f32 %v1423_v29, %v643_v17 }
 0x249   :  { %1426 = vtanh.f32 %v1979_v43  ;;  %v648_v59 = vsel %vm647_vm4, %v1423_v29, %v644_v61 }
 0x24a   :  { %v653_v24 = vsel %vm650_vm5, %v652_v16, %v648_v59  ;;  %v2169_v16 = vld [vmem:[#allocation9_spill] sm:$0xff] }
 0x24f   :  { %v1427_v38 = vpop.eup %1426 }
 0x250   :  { %v659_v5 = vmul.f32 %v1427_v38, %v653_v24 }
 0x252   :  { %v660_v3 = vpack.c.bf16 %v659_v5, %v659_v5  ;;  %v1267_v9 = vrot.slane %v659_v5, 5 }
 0x254   :  { %669 = vmatmul.bf16.vlgmr.msra.gmra.mxu0 %v660_v3  ;;  %682 = vmatmul.bf16.vlgmr.msra.gmra.mxu1 %v660_v3  ;;  %v1983_v41 = vsel %vm1283_vm6, %v1940_v32, %v1267_v9 }
 0x255   :  { %695 = vmatmul.bf16.vlgmr.msra.gmra.mxu2 %v660_v3  ;;  %708 = vmatmul.bf16.vlgmr.msra.gmra.mxu3 %v660_v3 }
 0x256   :  { %901 = vmatpush.bf16.msra.mxu0 %v1613_v18  ;;  %914 = vmatpush.bf16.msra.mxu1 %v1615_v22 }
 0x257   :  { %927 = vmatpush.bf16.msra.mxu2 %v1626_v34  ;;  %940 = vmatpush.bf16.msra.mxu3 %v1618_v26 }
 0x25a   :  { %902 = vmatpush.bf16.msra.mxu0 %v1624_v33  ;;  %915 = vmatpush.bf16.msra.mxu1 %v1630_v36 }
 0x25b   :  { %928 = vmatpush.bf16.msra.mxu2 %v1638_v46  ;;  %941 = vmatpush.bf16.msra.mxu3 %v1632_v37 }
 0x25e   :  { %903 = vmatpush.bf16.msra.mxu0 %v1636_v45  ;;  %916 = vmatpush.bf16.msra.mxu1 %v1642_v49 }
 0x25f   :  { %929 = vmatpush.bf16.msra.mxu2 %v1647_v57  ;;  %942 = vmatpush.bf16.msra.mxu3 %v1644_v50 }
 0x262   :  { %904 = vmatpush.bf16.msra.mxu0 %v1656_v60  ;;  %917 = vmatpush.bf16.msra.mxu1 %v1660_v63 }
 0x263   :  { %930 = vmatpush.bf16.msra.mxu2 %v1665_v8  ;;  %943 = vmatpush.bf16.msra.mxu3 %v1662_v0 }
 0x266   :  { %905 = vmatpush.bf16.msra.mxu0 %v1668_v11  ;;  %918 = vmatpush.bf16.msra.mxu1 %v1672_v13 }
 0x267   :  { %931 = vmatpush.bf16.msra.mxu2 %v1678_v21  ;;  %944 = vmatpush.bf16.msra.mxu3 %v1674_v14 }
 0x26a   :  { %906 = vmatpush.bf16.msra.mxu0 %v1684_v23  ;;  %919 = vmatpush.bf16.msra.mxu1 %v1688_v27 }
 0x26b   :  { %932 = vmatpush.bf16.msra.mxu2 %v1693_v35  ;;  %945 = vmatpush.bf16.msra.mxu3 %v1690_v28 }
 0x26e   :  { %907 = vmatpush.bf16.msra.mxu0 %v1696_v40  ;;  %920 = vmatpush.bf16.msra.mxu1 %v1703_v44 }
 0x26f   :  { %933 = vmatpush.bf16.msra.mxu2 %v1708_v54  ;;  %946 = vmatpush.bf16.msra.mxu3 %v1705_v47 }
 0x272   :  { %908 = vmatpush.bf16.msra.mxu0 %v1714_v62  ;;  %921 = vmatpush.bf16.msra.mxu1 %v1718_v1 }
 0x273   :  { %934 = vmatpush.bf16.msra.mxu2 %v1723_v4  ;;  %947 = vmatpush.bf16.msra.mxu3 %v1720_v2 }
 0x2d1   :  { %v670_v32 = vpop.f32.mrf.mxu0  ;;  %v683_v55 = vpop.f32.mrf.mxu1 }
 0x2d2   :  { %v713_v42 = vadd.f32 %v670_v32, %v2166_v20  ;;  %v714_v29 = vadd.f32 %v683_v55, %v2167_v39 }
 0x2d4   :  { %v1358_v6 = vmul.f32 -1.442695, %v713_v42  ;;  %v1359_v7 = vmul.f32 -1.442695, %v714_v29 }
 0x2d6   :  { %1428 = vpow2.f32 %v1358_v6 }
 0x2d7   :  { %1430 = vpow2.f32 %v1359_v7 }
 0x2d8   :  { %v696_v10 = vpop.f32.mrf.mxu2  ;;  %v709_v12 = vpop.f32.mrf.mxu3 }
 0x2d9   :  { %v716_v30 = vadd.f32 %v709_v12, %v2168_v25  ;;  %v672_v51 = vpop.f32.mrf.mxu0  ;;  %v685_v19 = vpop.f32.mrf.mxu1  ;;  %v715_v38 = vadd.f32 %v696_v10, %v2169_v16 }
 0x2db   :  { %v1360_v15 = vmul.f32 -1.442695, %v716_v30 }
 0x2dc   :  { %v1429_v48 = vpop.eup %1428 }
 0x2dd   :  { %v1431_v52 = vpop.eup %1430  ;;  %v720_v53 = vadd.f32 1.0, %v1429_v48  ;;  %1432 = vpow2.f32 %v1360_v15 }
 0x2de   :  { %v739_v56 = vadd.f32 1.0, %v1431_v52 }
 0x2df   :  { %1434 = vrcp.f32 %v720_v53  ;;  %v732_v55 = vand.u32 2147483648, %v720_v53  ;;  %v730_v39 = vand.u32 2147483647, %v720_v53  ;;  %vm726_vm9 = vweird.f32 %v720_v53 }
 0x2e0   :  { %1436 = vrcp.f32 %v739_v56  ;;  %v698_v17 = vpop.f32.mrf.mxu2  ;;  %v711_v61 = vpop.f32.mrf.mxu3  ;;  %v751_v20 = vand.u32 2147483648, %v739_v56  ;;  %v749_v6 = vand.u32 2147483647, %v739_v56  ;;  %vm745_vm10 = vweird.f32 %v739_v56 }
 0x2e1   :  { %v733_v10 = vor.u32 1.1754944e-38, %v732_v55  ;;  %vm731_vm13 = vcmp.eq.f32.partialorder %v730_v39, 8.507059e+37  ;;  %v2170_v39 = vld [vmem:[#allocation11_spill] sm:$0xff] }
 0x2e2   :  { %v752_v51 = vor.u32 1.1754944e-38, %v751_v20  ;;  %vm750_vm14 = vcmp.eq.f32.partialorder %v749_v6, 8.507059e+37  ;;  %v2171_v6 = vld [vmem:[#allocation12_spill] sm:$0xff] }
 0x2e3   :  { %v1433_v31 = vpop.eup %1432 }
 0x2e4   :  { %v759_v58 = vadd.f32 1.0, %v1433_v31 }
 0x2e5   :  { %v1435_v59 = vpop.eup %1434 }
 0x2e6   :  { %v1437_v24 = vpop.eup %1436  ;;  %v722_v5 = vmul.f32 %v1435_v59, %v720_v53  ;;  %1438 = vrcp.f32 %v759_v58  ;;  %vm727_vm7 = vweird.f32 %v1435_v59  ;;  %vm765_vm0 = vweird.f32 %v759_v58 }
 0x2e7   :  { %v741_v3 = vmul.f32 %v1437_v24, %v739_v56  ;;  %1440 = vtanh.f32 %v715_v38  ;;  %vm746_vm8 = vweird.f32 %v1437_v24  ;;  %vm728_vm11 = vmor %vm726_vm9, %vm727_vm7 }
 0x2e8   :  { %v723_v9 = vsub.f32 1.0, %v722_v5  ;;  %vm747_vm12 = vmor %vm745_vm10, %vm746_vm8  ;;  %v771_v5 = vand.u32 2147483648, %v759_v58 }
 0x2e9   :  { %v742_v32 = vsub.f32 1.0, %v741_v3 }
 0x2ea   :  { %v724_v42 = vmul.f32 %v1435_v59, %v723_v9  ;;  %v772_v9 = vor.u32 1.1754944e-38, %v771_v5 }
 0x2eb   :  { %v743_v29 = vmul.f32 %v1437_v24, %v742_v32 }
 0x2ec   :  { %v1439_v7 = vpop.eup %1438  ;;  %v725_v12 = vadd.f32 %v1435_v59, %v724_v42 }
 0x2ed   :  { %v744_v25 = vadd.f32 %v1437_v24, %v743_v29  ;;  %v761_v30 = vmul.f32 %v1439_v7, %v759_v58  ;;  %v1441_v15 = vpop.eup %1440  ;;  %vm766_vm15 = vweird.f32 %v1439_v7 }
 0x2ee   :  { %v729_v19 = vsel %vm728_vm11, %v1435_v59, %v725_v12  ;;  %v769_v59 = vand.u32 2147483647, %v759_v58  ;;  %vm767_vm1 = vmor %vm765_vm0, %vm766_vm15  ;;  %vm1287_vm0 = vcmask 1043456  }
 0x2ef   :  { %v734_v48 = vsel %vm731_vm13, %v733_v10, %v729_v19  ;;  %v748_v52 = vsel %vm747_vm12, %v1437_v24, %v744_v25  ;;  %v762_v17 = vsub.f32 1.0, %v761_v30 }
 0x2f0   :  { %v753_v61 = vsel %vm750_vm14, %v752_v51, %v748_v52  ;;  %v776_v31 = vmul.f32 %v1441_v15, %v734_v48  ;;  %vm770_vm2 = vcmp.eq.f32.partialorder %v769_v59, 8.507059e+37  ;;  %v2172_v51 = vld [vmem:[#allocation14_spill] sm:$0xff] }
 0x2f1   :  { %v775_v16 = vmul.f32 %v753_v61, %v1979_v43  ;;  %v763_v38 = vmul.f32 %v1439_v7, %v762_v17 }
 0x2f3   :  { %v2022_v53 = vadd.f32 %v776_v31, %v775_v16  ;;  %v764_v56 = vadd.f32 %v1439_v7, %v763_v38 }
 0x2f5   :  { %1442 = vtanh.f32 %v2022_v53  ;;  %v768_v3 = vsel %vm767_vm1, %v1439_v7, %v764_v56 }
 0x2f6   :  { %v773_v32 = vsel %vm770_vm2, %v772_v9, %v768_v3  ;;  %v2173_v9 = vld [vmem:[#allocation13_spill] sm:$0xff] }
 0x2fb   :  { %v1443_v24 = vpop.eup %1442 }
 0x2fc   :  { %v779_v55 = vmul.f32 %v1443_v24, %v773_v32 }
 0x2fe   :  { %v780_v20 = vpack.c.bf16 %v779_v55, %v779_v55  ;;  %v1270_v43 = vrot.slane %v779_v55, 4 }
 0x300   :  { %789 = vmatmul.bf16.vlgmr.msrb.gmra.mxu0 %v780_v20  ;;  %802 = vmatmul.bf16.vlgmr.msrb.gmra.mxu1 %v780_v20  ;;  %v2026_v42 = vsel %vm1285_vm3, %v1983_v41, %v1270_v43 }
 0x301   :  { %815 = vmatmul.bf16.vlgmr.msrb.gmra.mxu2 %v780_v20  ;;  %828 = vmatmul.bf16.vlgmr.msrb.gmra.mxu3 %v780_v20 }
 0x302   :  { %1021 = vmatpush.bf16.msrb.mxu0 %v1613_v18  ;;  %1034 = vmatpush.bf16.msrb.mxu1 %v1615_v22 }
 0x303   :  { %1047 = vmatpush.bf16.msrb.mxu2 %v1626_v34  ;;  %1060 = vmatpush.bf16.msrb.mxu3 %v1618_v26 }
 0x306   :  { %1022 = vmatpush.bf16.msrb.mxu0 %v1624_v33  ;;  %1035 = vmatpush.bf16.msrb.mxu1 %v1630_v36 }
 0x307   :  { %1048 = vmatpush.bf16.msrb.mxu2 %v1638_v46  ;;  %1061 = vmatpush.bf16.msrb.mxu3 %v1632_v37 }
 0x30a   :  { %1023 = vmatpush.bf16.msrb.mxu0 %v1636_v45  ;;  %1036 = vmatpush.bf16.msrb.mxu1 %v1642_v49 }
 0x30b   :  { %1049 = vmatpush.bf16.msrb.mxu2 %v1647_v57  ;;  %1062 = vmatpush.bf16.msrb.mxu3 %v1644_v50 }
 0x30e   :  { %1024 = vmatpush.bf16.msrb.mxu0 %v1656_v60  ;;  %1037 = vmatpush.bf16.msrb.mxu1 %v1660_v63 }
 0x30f   :  { %1050 = vmatpush.bf16.msrb.mxu2 %v1665_v8  ;;  %1063 = vmatpush.bf16.msrb.mxu3 %v1662_v0 }
 0x312   :  { %1025 = vmatpush.bf16.msrb.mxu0 %v1668_v11  ;;  %1038 = vmatpush.bf16.msrb.mxu1 %v1672_v13 }
 0x313   :  { %1051 = vmatpush.bf16.msrb.mxu2 %v1678_v21  ;;  %1064 = vmatpush.bf16.msrb.mxu3 %v1674_v14 }
 0x316   :  { %1026 = vmatpush.bf16.msrb.mxu0 %v1684_v23  ;;  %1039 = vmatpush.bf16.msrb.mxu1 %v1688_v27 }
 0x317   :  { %1052 = vmatpush.bf16.msrb.mxu2 %v1693_v35  ;;  %1065 = vmatpush.bf16.msrb.mxu3 %v1690_v28 }
 0x31a   :  { %1027 = vmatpush.bf16.msrb.mxu0 %v1696_v40  ;;  %1040 = vmatpush.bf16.msrb.mxu1 %v1703_v44 }
 0x31b   :  { %1053 = vmatpush.bf16.msrb.mxu2 %v1708_v54  ;;  %1066 = vmatpush.bf16.msrb.mxu3 %v1705_v47 }
 0x31e   :  { %1028 = vmatpush.bf16.msrb.mxu0 %v1714_v62  ;;  %1041 = vmatpush.bf16.msrb.mxu1 %v1718_v1 }
 0x31f   :  { %1054 = vmatpush.bf16.msrb.mxu2 %v1723_v4  ;;  %1067 = vmatpush.bf16.msrb.mxu3 %v1720_v2 }
 0x37d   :  { %v790_v41 = vpop.f32.mrf.mxu0  ;;  %v803_v58 = vpop.f32.mrf.mxu1 }
 0x37e   :  { %v833_v29 = vadd.f32 %v790_v41, %v2170_v39  ;;  %v834_v7 = vadd.f32 %v803_v58, %v2171_v6 }
 0x380   :  { %v1361_v12 = vmul.f32 -1.442695, %v833_v29  ;;  %v1362_v10 = vmul.f32 -1.442695, %v834_v7 }
 0x382   :  { %1444 = vpow2.f32 %v1361_v12 }
 0x383   :  { %1446 = vpow2.f32 %v1362_v10 }
 0x384   :  { %v816_v25 = vpop.f32.mrf.mxu2  ;;  %v829_v30 = vpop.f32.mrf.mxu3 }
 0x385   :  { %v836_v19 = vadd.f32 %v829_v30, %v2172_v51  ;;  %v792_v15 = vpop.f32.mrf.mxu0  ;;  %v805_v48 = vpop.f32.mrf.mxu1  ;;  %v835_v24 = vadd.f32 %v816_v25, %v2173_v9 }
 0x387   :  { %v1363_v52 = vmul.f32 -1.442695, %v836_v19 }
 0x388   :  { %v1445_v17 = vpop.eup %1444 }
 0x389   :  { %v1447_v61 = vpop.eup %1446  ;;  %v840_v31 = vadd.f32 1.0, %v1445_v17  ;;  %1448 = vpow2.f32 %v1363_v52 }
 0x38a   :  { %v859_v16 = vadd.f32 1.0, %v1447_v61 }
 0x38b   :  { %1450 = vrcp.f32 %v840_v31  ;;  %v852_v58 = vand.u32 2147483648, %v840_v31  ;;  %v850_v6 = vand.u32 2147483647, %v840_v31  ;;  %vm846_vm6 = vweird.f32 %v840_v31 }
 0x38c   :  { %1452 = vrcp.f32 %v859_v16  ;;  %v818_v38 = vpop.f32.mrf.mxu2  ;;  %v831_v56 = vpop.f32.mrf.mxu3  ;;  %v871_v39 = vand.u32 2147483648, %v859_v16  ;;  %v869_v12 = vand.u32 2147483647, %v859_v16  ;;  %vm865_vm7 = vweird.f32 %v859_v16 }
 0x38d   :  { %v853_v25 = vor.u32 1.1754944e-38, %v852_v58  ;;  %vm851_vm10 = vcmp.eq.f32.partialorder %v850_v6, 8.507059e+37 }
 0x38e   :  { %v872_v15 = vor.u32 1.1754944e-38, %v871_v39  ;;  %vm870_vm11 = vcmp.eq.f32.partialorder %v869_v12, 8.507059e+37 }
 0x38f   :  { %v1449_v5 = vpop.eup %1448 }
 0x390   :  { %v879_v59 = vadd.f32 1.0, %v1449_v5 }
 0x391   :  { %v1451_v3 = vpop.eup %1450 }
 0x392   :  { %v1453_v32 = vpop.eup %1452  ;;  %v842_v55 = vmul.f32 %v1451_v3, %v840_v31  ;;  %1454 = vrcp.f32 %v879_v59  ;;  %vm847_vm4 = vweird.f32 %v1451_v3  ;;  %vm885_vm13 = vweird.f32 %v879_v59 }
 0x393   :  { %v861_v20 = vmul.f32 %v1453_v32, %v859_v16  ;;  %1456 = vtanh.f32 %v835_v24  ;;  %vm866_vm5 = vweird.f32 %v1453_v32  ;;  %vm848_vm8 = vmor %vm846_vm6, %vm847_vm4 }
 0x394   :  { %v843_v43 = vsub.f32 1.0, %v842_v55  ;;  %vm867_vm9 = vmor %vm865_vm7, %vm866_vm5  ;;  %v891_v55 = vand.u32 2147483648, %v879_v59 }
 0x395   :  { %v862_v41 = vsub.f32 1.0, %v861_v20 }
 0x396   :  { %v844_v29 = vmul.f32 %v1451_v3, %v843_v43  ;;  %v892_v43 = vor.u32 1.1754944e-38, %v891_v55 }
 0x397   :  { %v863_v7 = vmul.f32 %v1453_v32, %v862_v41 }
 0x398   :  { %v1455_v10 = vpop.eup %1454  ;;  %v845_v30 = vadd.f32 %v1451_v3, %v844_v29 }
 0x399   :  { %v864_v51 = vadd.f32 %v1453_v32, %v863_v7  ;;  %v881_v19 = vmul.f32 %v1455_v10, %v879_v59  ;;  %v1457_v52 = vpop.eup %1456  ;;  %vm886_vm12 = vweird.f32 %v1455_v10 }
 0x39a   :  { %v849_v48 = vsel %vm848_vm8, %v1451_v3, %v845_v30  ;;  %v889_v3 = vand.u32 2147483647, %v879_v59  ;;  %vm887_vm14 = vmor %vm885_vm13, %vm886_vm12  ;;  %vm1289_vm13 = vcmask 1044480  }
 0x39b   :  { %v854_v17 = vsel %vm851_vm10, %v853_v25, %v849_v48  ;;  %v868_v61 = vsel %vm867_vm9, %v1453_v32, %v864_v51  ;;  %v882_v38 = vsub.f32 1.0, %v881_v19 }
 0x39c   :  { %v873_v56 = vsel %vm870_vm11, %v872_v15, %v868_v61  ;;  %v896_v5 = vmul.f32 %v1457_v52, %v854_v17  ;;  %vm890_vm15 = vcmp.eq.f32.partialorder %v889_v3, 8.507059e+37 }
 0x39d   :  { %v895_v9 = vmul.f32 %v873_v56, %v2022_v53  ;;  %v883_v24 = vmul.f32 %v1455_v10, %v882_v38 }
 0x39f   :  { %v2065_v31 = vadd.f32 %v896_v5, %v895_v9  ;;  %v884_v16 = vadd.f32 %v1455_v10, %v883_v24 }
 0x3a1   :  { %1458 = vtanh.f32 %v2065_v31  ;;  %v888_v20 = vsel %vm887_vm14, %v1455_v10, %v884_v16 }
 0x3a2   :  { %v893_v41 = vsel %vm890_vm15, %v892_v43, %v888_v20 }
 0x3a7   :  { %v1459_v32 = vpop.eup %1458 }
 0x3a8   :  { %v899_v58 = vmul.f32 %v1459_v32, %v893_v41 }
 0x3aa   :  { %v900_v39 = vpack.c.bf16 %v899_v58, %v899_v58  ;;  %v1273_v53 = vrot.slane %v899_v58, 3 }
 0x3ac   :  { %909 = vmatmul.bf16.vlgmr.msra.gmra.mxu0 %v900_v39  ;;  %922 = vmatmul.bf16.vlgmr.msra.gmra.mxu1 %v900_v39  ;;  %v2069_v29 = vsel %vm1287_vm0, %v2026_v42, %v1273_v53 }
 0x3ad   :  { %935 = vmatmul.bf16.vlgmr.msra.gmra.mxu2 %v900_v39  ;;  %948 = vmatmul.bf16.vlgmr.msra.gmra.mxu3 %v900_v39 }
 0x3ae   :  { %1141 = vmatpush.bf16.msra.mxu0 %v1613_v18  ;;  %1154 = vmatpush.bf16.msra.mxu1 %v1615_v22 }
 0x3af   :  { %1167 = vmatpush.bf16.msra.mxu2 %v1626_v34  ;;  %1180 = vmatpush.bf16.msra.mxu3 %v1618_v26  ;;  %v2174_v26 = vld [vmem:[#allocation15_spill] sm:$0xff]  ;;  %v2175_v34 = vld [vmem:[#allocation16_spill] sm:$0xff] }
 0x3b2   :  { %1142 = vmatpush.bf16.msra.mxu0 %v1624_v33  ;;  %1155 = vmatpush.bf16.msra.mxu1 %v1630_v36 }
 0x3b3   :  { %1168 = vmatpush.bf16.msra.mxu2 %v1638_v46  ;;  %1181 = vmatpush.bf16.msra.mxu3 %v1632_v37 }
 0x3b6   :  { %1143 = vmatpush.bf16.msra.mxu0 %v1636_v45  ;;  %1156 = vmatpush.bf16.msra.mxu1 %v1642_v49 }
 0x3b7   :  { %1169 = vmatpush.bf16.msra.mxu2 %v1647_v57  ;;  %1182 = vmatpush.bf16.msra.mxu3 %v1644_v50  ;;  %v2176_v50 = vld [vmem:[#allocation18_spill] sm:$0xff] }
 0x3ba   :  { %1144 = vmatpush.bf16.msra.mxu0 %v1656_v60  ;;  %1157 = vmatpush.bf16.msra.mxu1 %v1660_v63 }
 0x3bb   :  { %1170 = vmatpush.bf16.msra.mxu2 %v1665_v8  ;;  %1183 = vmatpush.bf16.msra.mxu3 %v1662_v0 }
 0x3be   :  { %1145 = vmatpush.bf16.msra.mxu0 %v1668_v11  ;;  %1158 = vmatpush.bf16.msra.mxu1 %v1672_v13 }
 0x3bf   :  { %1171 = vmatpush.bf16.msra.mxu2 %v1678_v21  ;;  %1184 = vmatpush.bf16.msra.mxu3 %v1674_v14 }
 0x3c2   :  { %1146 = vmatpush.bf16.msra.mxu0 %v1684_v23  ;;  %1159 = vmatpush.bf16.msra.mxu1 %v1688_v27 }
 0x3c3   :  { %1172 = vmatpush.bf16.msra.mxu2 %v1693_v35  ;;  %1185 = vmatpush.bf16.msra.mxu3 %v1690_v28 }
 0x3c6   :  { %1147 = vmatpush.bf16.msra.mxu0 %v1696_v40  ;;  %1160 = vmatpush.bf16.msra.mxu1 %v1703_v44  ;;  %v2177_v40 = vld [vmem:[#allocation17_spill] sm:$0xff] }
 0x3c7   :  { %1173 = vmatpush.bf16.msra.mxu2 %v1708_v54  ;;  %1186 = vmatpush.bf16.msra.mxu3 %v1705_v47 }
 0x3ca   :  { %1148 = vmatpush.bf16.msra.mxu0 %v1714_v62  ;;  %1161 = vmatpush.bf16.msra.mxu1 %v1718_v1 }
 0x3cb   :  { %1174 = vmatpush.bf16.msra.mxu2 %v1723_v4  ;;  %1187 = vmatpush.bf16.msra.mxu3 %v1720_v2 }
 0x429   :  { %v910_v18 = vpop.f32.mrf.mxu0  ;;  %v923_v22 = vpop.f32.mrf.mxu1 }
 0x42a   :  { %v953_v33 = vadd.f32 %v910_v18, %v2174_v26  ;;  %v954_v36 = vadd.f32 %v923_v22, %v2175_v34 }
 0x42c   :  { %v1364_v37 = vmul.f32 -1.442695, %v953_v33  ;;  %v1365_v45 = vmul.f32 -1.442695, %v954_v36  ;;  %v2178_v33 = vld [vmem:[#allocation19_spill] sm:$0xff]  ;;  %v2179_v36 = vld [vmem:[#allocation20_spill] sm:$0xff] }
 0x42e   :  { %1460 = vpow2.f32 %v1364_v37 }
 0x42f   :  { %1462 = vpow2.f32 %v1365_v45 }
 0x430   :  { %v936_v46 = vpop.f32.mrf.mxu2  ;;  %v949_v49 = vpop.f32.mrf.mxu3 }
 0x431   :  { %v956_v57 = vadd.f32 %v949_v49, %v2176_v50  ;;  %v912_v60 = vpop.f32.mrf.mxu0  ;;  %v925_v63 = vpop.f32.mrf.mxu1  ;;  %v955_v44 = vadd.f32 %v936_v46, %v2177_v40  ;;  %v2181_v40 = vld [vmem:[#allocation21_spill] sm:$0xff] }
 0x433   :  { %v1366_v0 = vmul.f32 -1.442695, %v956_v57  ;;  %v2180_v57 = vld [vmem:[#allocation22_spill] sm:$0xff] }
 0x434   :  { %v1461_v8 = vpop.eup %1460 }
 0x435   :  { %v1463_v11 = vpop.eup %1462  ;;  %v960_v13 = vadd.f32 1.0, %v1461_v8  ;;  %1464 = vpow2.f32 %v1366_v0 }
 0x436   :  { %v979_v14 = vadd.f32 1.0, %v1463_v11 }
 0x437   :  { %1466 = vrcp.f32 %v960_v13  ;;  %v972_v4 = vand.u32 2147483648, %v960_v13  ;;  %v970_v6 = vand.u32 2147483647, %v960_v13  ;;  %vm966_vm3 = vweird.f32 %v960_v13 }
 0x438   :  { %1468 = vrcp.f32 %v979_v14  ;;  %v938_v21 = vpop.f32.mrf.mxu2  ;;  %v951_v23 = vpop.f32.mrf.mxu3  ;;  %v991_v42 = vand.u32 2147483648, %v979_v14  ;;  %v989_v12 = vand.u32 2147483647, %v979_v14  ;;  %vm985_vm4 = vweird.f32 %v979_v14 }
 0x439   :  { %v973_v25 = vor.u32 1.1754944e-38, %v972_v4  ;;  %vm971_vm7 = vcmp.eq.f32.partialorder %v970_v6, 8.507059e+37 }
 0x43a   :  { %v992_v15 = vor.u32 1.1754944e-38, %v991_v42  ;;  %vm990_vm8 = vcmp.eq.f32.partialorder %v989_v12, 8.507059e+37 }
 0x43b   :  { %v1465_v27 = vpop.eup %1464 }
 0x43c   :  { %v999_v28 = vadd.f32 1.0, %v1465_v27 }
 0x43d   :  { %v1467_v35 = vpop.eup %1466 }
 0x43e   :  { %v1469_v47 = vpop.eup %1468  ;;  %v962_v54 = vmul.f32 %v1467_v35, %v960_v13  ;;  %1470 = vrcp.f32 %v999_v28  ;;  %vm967_vm1 = vweird.f32 %v1467_v35  ;;  %v1011_v3 = vand.u32 2147483648, %v999_v28 }
 0x43f   :  { %v981_v62 = vmul.f32 %v1469_v47, %v979_v14  ;;  %1472 = vtanh.f32 %v955_v44  ;;  %vm986_vm2 = vweird.f32 %v1469_v47  ;;  %vm968_vm5 = vmor %vm966_vm3, %vm967_vm1  ;;  %vm1005_vm10 = vweird.f32 %v999_v28 }
 0x440   :  { %v963_v1 = vsub.f32 1.0, %v962_v54  ;;  %vm987_vm6 = vmor %vm985_vm4, %vm986_vm2  ;;  %v1009_v20 = vand.u32 2147483647, %v999_v28  ;;  %v1012_v32 = vor.u32 1.1754944e-38, %v1011_v3 }
 0x441   :  { %v982_v2 = vsub.f32 1.0, %v981_v62 }
 0x442   :  { %v964_v59 = vmul.f32 %v1467_v35, %v963_v1  ;;  %vm1010_vm12 = vcmp.eq.f32.partialorder %v1009_v20, 8.507059e+37 }
 0x443   :  { %v983_v7 = vmul.f32 %v1469_v47, %v982_v2 }
 0x444   :  { %v1471_v10 = vpop.eup %1470  ;;  %v965_v30 = vadd.f32 %v1467_v35, %v964_v59 }
 0x445   :  { %v984_v51 = vadd.f32 %v1469_v47, %v983_v7  ;;  %v1001_v19 = vmul.f32 %v1471_v10, %v999_v28  ;;  %v1473_v52 = vpop.eup %1472  ;;  %vm1006_vm9 = vweird.f32 %v1471_v10 }
 0x446   :  { %v969_v48 = vsel %vm968_vm5, %v1467_v35, %v965_v30  ;;  %vm1007_vm11 = vmor %vm1005_vm10, %vm1006_vm9  ;;  %vm1291_vm10 = vcmask 1045504  }
 0x447   :  { %v974_v17 = vsel %vm971_vm7, %v973_v25, %v969_v48  ;;  %v988_v61 = vsel %vm987_vm6, %v1469_v47, %v984_v51  ;;  %v1002_v38 = vsub.f32 1.0, %v1001_v19 }
 0x448   :  { %v993_v56 = vsel %vm990_vm8, %v992_v15, %v988_v61  ;;  %v1016_v5 = vmul.f32 %v1473_v52, %v974_v17 }
 0x449   :  { %v1015_v9 = vmul.f32 %v993_v56, %v2065_v31  ;;  %v1003_v24 = vmul.f32 %v1471_v10, %v1002_v38 }
 0x44b   :  { %v2108_v16 = vadd.f32 %v1016_v5, %v1015_v9  ;;  %v1004_v55 = vadd.f32 %v1471_v10, %v1003_v24 }
 0x44d   :  { %1474 = vtanh.f32 %v2108_v16  ;;  %v1008_v43 = vsel %vm1007_vm11, %v1471_v10, %v1004_v55 }
 0x44e   :  { %v1013_v58 = vsel %vm1010_vm12, %v1012_v32, %v1008_v43 }
 0x453   :  { %v1475_v41 = vpop.eup %1474 }
 0x454   :  { %v1019_v39 = vmul.f32 %v1475_v41, %v1013_v58 }
 0x456   :  { %v1020_v53 = vpack.c.bf16 %v1019_v39, %v1019_v39  ;;  %v1276_v31 = vrot.slane %v1019_v39, 2 }
 0x458   :  { %1029 = vmatmul.bf16.vlgmr.msrb.gmra.mxu0 %v1020_v53  ;;  %1042 = vmatmul.bf16.vlgmr.msrb.gmra.mxu1 %v1020_v53  ;;  %v2112_v18 = vsel %vm1289_vm13, %v2069_v29, %v1276_v31 }
 0x459   :  { %1055 = vmatmul.bf16.vlgmr.msrb.gmra.mxu2 %v1020_v53  ;;  %1068 = vmatmul.bf16.vlgmr.msrb.gmra.mxu3 %v1020_v53 }
 0x4d5   :  { %v1030_v22 = vpop.f32.mrf.mxu0  ;;  %v1043_v26 = vpop.f32.mrf.mxu1 }
 0x4d6   :  { %v1073_v34 = vadd.f32 %v1030_v22, %v2178_v33  ;;  %v1074_v37 = vadd.f32 %v1043_v26, %v2179_v36 }
 0x4d8   :  { %v1367_v45 = vmul.f32 -1.442695, %v1073_v34  ;;  %v1368_v46 = vmul.f32 -1.442695, %v1074_v37  ;;  %v2182_v34 = vld [vmem:[#allocation23_spill] sm:$0xff]  ;;  %v2183_v37 = vld [vmem:[#allocation24_spill] sm:$0xff] }
 0x4da   :  { %1476 = vpow2.f32 %v1367_v45 }
 0x4db   :  { %1478 = vpow2.f32 %v1368_v46 }
 0x4dc   :  { %v1056_v49 = vpop.f32.mrf.mxu2  ;;  %v1069_v50 = vpop.f32.mrf.mxu3 }
 0x4dd   :  { %v1076_v60 = vadd.f32 %v1069_v50, %v2180_v57  ;;  %v1032_v63 = vpop.f32.mrf.mxu0  ;;  %v1045_v0 = vpop.f32.mrf.mxu1  ;;  %v1075_v44 = vadd.f32 %v1056_v49, %v2181_v40  ;;  %v2185_v40 = vld [vmem:[#allocation25_spill] sm:$0xff] }
 0x4df   :  { %v1369_v29 = vmul.f32 -1.442695, %v1076_v60  ;;  %v2184_v60 = vld [vmem:[#allocation26_spill] sm:$0xff] }
 0x4e0   :  { %v1477_v8 = vpop.eup %1476 }
 0x4e1   :  { %v1479_v11 = vpop.eup %1478  ;;  %v1080_v13 = vadd.f32 1.0, %v1477_v8  ;;  %1480 = vpow2.f32 %v1369_v29 }
 0x4e2   :  { %v1099_v14 = vadd.f32 1.0, %v1479_v11 }
 0x4e3   :  { %1482 = vrcp.f32 %v1080_v13  ;;  %v1092_v4 = vand.u32 2147483648, %v1080_v13  ;;  %v1090_v6 = vand.u32 2147483647, %v1080_v13  ;;  %vm1086_vm0 = vweird.f32 %v1080_v13 }
 0x4e4   :  { %1484 = vrcp.f32 %v1099_v14  ;;  %v1058_v21 = vpop.f32.mrf.mxu2  ;;  %v1071_v23 = vpop.f32.mrf.mxu3  ;;  %v1111_v42 = vand.u32 2147483648, %v1099_v14  ;;  %v1109_v12 = vand.u32 2147483647, %v1099_v14  ;;  %vm1105_vm1 = vweird.f32 %v1099_v14 }
 0x4e5   :  { %v1093_v25 = vor.u32 1.1754944e-38, %v1092_v4  ;;  %vm1091_vm4 = vcmp.eq.f32.partialorder %v1090_v6, 8.507059e+37 }
 0x4e6   :  { %v1112_v15 = vor.u32 1.1754944e-38, %v1111_v42  ;;  %vm1110_vm5 = vcmp.eq.f32.partialorder %v1109_v12, 8.507059e+37 }
 0x4e7   :  { %v1481_v27 = vpop.eup %1480 }
 0x4e8   :  { %v1119_v28 = vadd.f32 1.0, %v1481_v27 }
 0x4e9   :  { %v1483_v35 = vpop.eup %1482 }
 0x4ea   :  { %v1485_v47 = vpop.eup %1484  ;;  %v1082_v54 = vmul.f32 %v1483_v35, %v1080_v13  ;;  %1486 = vrcp.f32 %v1119_v28  ;;  %vm1087_vm14 = vweird.f32 %v1483_v35  ;;  %v1131_v20 = vand.u32 2147483648, %v1119_v28 }
 0x4eb   :  { %v1101_v62 = vmul.f32 %v1485_v47, %v1099_v14  ;;  %1488 = vtanh.f32 %v1075_v44  ;;  %vm1106_vm15 = vweird.f32 %v1485_v47  ;;  %vm1088_vm2 = vmor %vm1086_vm0, %vm1087_vm14  ;;  %vm1125_vm7 = vweird.f32 %v1119_v28 }
 0x4ec   :  { %v1083_v1 = vsub.f32 1.0, %v1082_v54  ;;  %vm1107_vm3 = vmor %vm1105_vm1, %vm1106_vm15  ;;  %v1129_v43 = vand.u32 2147483647, %v1119_v28  ;;  %v1132_v41 = vor.u32 1.1754944e-38, %v1131_v20 }
 0x4ed   :  { %v1102_v2 = vsub.f32 1.0, %v1101_v62 }
 0x4ee   :  { %v1084_v59 = vmul.f32 %v1483_v35, %v1083_v1  ;;  %vm1130_vm9 = vcmp.eq.f32.partialorder %v1129_v43, 8.507059e+37 }
 0x4ef   :  { %v1103_v7 = vmul.f32 %v1485_v47, %v1102_v2 }
 0x4f0   :  { %v1487_v10 = vpop.eup %1486  ;;  %v1085_v30 = vadd.f32 %v1483_v35, %v1084_v59 }
 0x4f1   :  { %v1104_v51 = vadd.f32 %v1485_v47, %v1103_v7  ;;  %v1121_v19 = vmul.f32 %v1487_v10, %v1119_v28  ;;  %v1489_v52 = vpop.eup %1488  ;;  %vm1126_vm6 = vweird.f32 %v1487_v10 }
 0x4f2   :  { %v1089_v48 = vsel %vm1088_vm2, %v1483_v35, %v1085_v30  ;;  %vm1127_vm8 = vmor %vm1125_vm7, %vm1126_vm6  ;;  %vm1293_vm7 = vcmask 1046528  }
 0x4f3   :  { %v1094_v17 = vsel %vm1091_vm4, %v1093_v25, %v1089_v48  ;;  %v1108_v61 = vsel %vm1107_vm3, %v1485_v47, %v1104_v51  ;;  %v1122_v38 = vsub.f32 1.0, %v1121_v19 }
 0x4f4   :  { %v1113_v56 = vsel %vm1110_vm5, %v1112_v15, %v1108_v61  ;;  %v1136_v5 = vmul.f32 %v1489_v52, %v1094_v17 }
 0x4f5   :  { %v1135_v9 = vmul.f32 %v1113_v56, %v2108_v16  ;;  %v1123_v24 = vmul.f32 %v1487_v10, %v1122_v38 }
 0x4f7   :  { %v2119_v55 = vadd.f32 %v1136_v5, %v1135_v9  ;;  %v1124_v3 = vadd.f32 %v1487_v10, %v1123_v24 }
 0x4f9   :  { %1490 = vtanh.f32 %v2119_v55  ;;  %v1128_v32 = vsel %vm1127_vm8, %v1487_v10, %v1124_v3 }
 0x4fa   :  { %v1133_v39 = vsel %vm1130_vm9, %v1132_v41, %v1128_v32 }
 0x4ff   :  { %v1491_v58 = vpop.eup %1490 }
 0x500   :  { %v1139_v53 = vmul.f32 %v1491_v58, %v1133_v39 }
 0x502   :  { %v1140_v31 = vpack.c.bf16 %v1139_v53, %v1139_v53  ;;  %v1279_v16 = vrot.slane %v1139_v53, 1 }
 0x504   :  { %1149 = vmatmul.bf16.vlgmr.msra.gmra.mxu0 %v1140_v31  ;;  %1162 = vmatmul.bf16.vlgmr.msra.gmra.mxu1 %v1140_v31  ;;  %v2123_v22 = vsel %vm1291_vm10, %v2112_v18, %v1279_v16 }
 0x505   :  { %1175 = vmatmul.bf16.vlgmr.msra.gmra.mxu2 %v1140_v31  ;;  %1188 = vmatmul.bf16.vlgmr.msra.gmra.mxu3 %v1140_v31  ;;  %v1378_v31 = vld [vmem:[%s2141_s4] ss:$0 sm:$0xff] }
 0x581   :  { %v1150_v26 = vpop.f32.mrf.mxu0  ;;  %v1163_v33 = vpop.f32.mrf.mxu1 }
 0x582   :  { %v1193_v36 = vadd.f32 %v1150_v26, %v2182_v34  ;;  %v1194_v45 = vadd.f32 %v1163_v33, %v2183_v37  ;;  %v1379_v33 = vld [vmem:[#allocation2] ss:$0 sm:$0xff] }
 0x584   :  { %v1370_v46 = vmul.f32 -1.442695, %v1193_v36  ;;  %v1371_v49 = vmul.f32 -1.442695, %v1194_v45 }
 0x586   :  { %1492 = vpow2.f32 %v1370_v46 }
 0x587   :  { %1494 = vpow2.f32 %v1371_v49 }
 0x588   :  { %v1176_v50 = vpop.f32.mrf.mxu2  ;;  %v1189_v57 = vpop.f32.mrf.mxu3 }
 0x589   :  { %v1196_v63 = vadd.f32 %v1189_v57, %v2184_v60  ;;  %v1152_v0 = vpop.f32.mrf.mxu0  ;;  %v1165_v29 = vpop.f32.mrf.mxu1  ;;  %v1195_v44 = vadd.f32 %v1176_v50, %v2185_v40 }
 0x58b   :  { %v1372_v18 = vmul.f32 -1.442695, %v1196_v63 }
 0x58c   :  { %v1493_v8 = vpop.eup %1492 }
 0x58d   :  { %v1495_v11 = vpop.eup %1494  ;;  %v1200_v13 = vadd.f32 1.0, %v1493_v8  ;;  %1496 = vpow2.f32 %v1372_v18 }
 0x58e   :  { %v1219_v14 = vadd.f32 1.0, %v1495_v11 }
 0x58f   :  { %1498 = vrcp.f32 %v1200_v13  ;;  %v1212_v4 = vand.u32 2147483648, %v1200_v13  ;;  %v1210_v6 = vand.u32 2147483647, %v1200_v13  ;;  %vm1206_vm13 = vweird.f32 %v1200_v13 }
 0x590   :  { %1500 = vrcp.f32 %v1219_v14  ;;  %v1178_v21 = vpop.f32.mrf.mxu2  ;;  %v1191_v23 = vpop.f32.mrf.mxu3  ;;  %v1231_v42 = vand.u32 2147483648, %v1219_v14  ;;  %v1229_v12 = vand.u32 2147483647, %v1219_v14  ;;  %vm1225_vm14 = vweird.f32 %v1219_v14 }
 0x591   :  { %v1213_v25 = vor.u32 1.1754944e-38, %v1212_v4  ;;  %vm1211_vm1 = vcmp.eq.f32.partialorder %v1210_v6, 8.507059e+37 }
 0x592   :  { %v1232_v15 = vor.u32 1.1754944e-38, %v1231_v42  ;;  %vm1230_vm2 = vcmp.eq.f32.partialorder %v1229_v12, 8.507059e+37 }
 0x593   :  { %v1497_v27 = vpop.eup %1496 }
 0x594   :  { %v1239_v28 = vadd.f32 1.0, %v1497_v27 }
 0x595   :  { %v1499_v35 = vpop.eup %1498 }
 0x596   :  { %v1501_v47 = vpop.eup %1500  ;;  %v1202_v54 = vmul.f32 %v1499_v35, %v1200_v13  ;;  %1502 = vrcp.f32 %v1239_v28  ;;  %vm1207_vm11 = vweird.f32 %v1499_v35  ;;  %v1251_v43 = vand.u32 2147483648, %v1239_v28 }
 0x597   :  { %v1221_v62 = vmul.f32 %v1501_v47, %v1219_v14  ;;  %1504 = vtanh.f32 %v1195_v44  ;;  %vm1226_vm12 = vweird.f32 %v1501_v47  ;;  %vm1208_vm15 = vmor %vm1206_vm13, %vm1207_vm11  ;;  %vm1245_vm4 = vweird.f32 %v1239_v28 }
 0x598   :  { %v1203_v1 = vsub.f32 1.0, %v1202_v54  ;;  %vm1227_vm0 = vmor %vm1225_vm14, %vm1226_vm12  ;;  %v1249_v32 = vand.u32 2147483647, %v1239_v28  ;;  %v1252_v58 = vor.u32 1.1754944e-38, %v1251_v43  ;;  %vm1326_vm11 = vcmask 7168  }
 0x599   :  { %v1222_v2 = vsub.f32 1.0, %v1221_v62 }
 0x59a   :  { %v1204_v59 = vmul.f32 %v1499_v35, %v1203_v1  ;;  %vm1250_vm6 = vcmp.eq.f32.partialorder %v1249_v32, 8.507059e+37 }
 0x59b   :  { %v1223_v7 = vmul.f32 %v1501_v47, %v1222_v2 }
 0x59c   :  { %v1503_v10 = vpop.eup %1502  ;;  %v1205_v30 = vadd.f32 %v1499_v35, %v1204_v59 }
 0x59d   :  { %v1224_v51 = vadd.f32 %v1501_v47, %v1223_v7  ;;  %v1241_v19 = vmul.f32 %v1503_v10, %v1239_v28  ;;  %v1505_v52 = vpop.eup %1504  ;;  %vm1246_vm3 = vweird.f32 %v1503_v10 }
 0x59e   :  { %v1209_v48 = vsel %vm1208_vm15, %v1499_v35, %v1205_v30  ;;  %vm1247_vm5 = vmor %vm1245_vm4, %vm1246_vm3 }
 0x59f   :  { %v1214_v17 = vsel %vm1211_vm1, %v1213_v25, %v1209_v48  ;;  %v1228_v61 = vsel %vm1227_vm0, %v1501_v47, %v1224_v51  ;;  %v1242_v38 = vsub.f32 1.0, %v1241_v19 }
 0x5a0   :  { %v1233_v56 = vsel %vm1230_vm2, %v1232_v15, %v1228_v61  ;;  %v1256_v5 = vmul.f32 %v1505_v52, %v1214_v17 }
 0x5a1   :  { %v1255_v9 = vmul.f32 %v1233_v56, %v2119_v55  ;;  %v1243_v24 = vmul.f32 %v1503_v10, %v1242_v38 }
 0x5a3   :  { %v1257_v3 = vadd.f32 %v1256_v5, %v1255_v9  ;;  %v1244_v20 = vadd.f32 %v1503_v10, %v1243_v24 }
 0x5a5   :  { %1506 = vtanh.f32 %v1257_v3  ;;  %v1248_v41 = vsel %vm1247_vm5, %v1503_v10, %v1244_v20 }
 0x5a6   :  { %v1253_v53 = vsel %vm1250_vm6, %v1252_v58, %v1248_v41 }
 0x5ab   :  { %v1507_v39 = vpop.eup %1506 }
 0x5ac   :  { %v1259_v55 = vmul.f32 %v1507_v39, %v1253_v53 }
 0x5ae   :  { %v1294_v16 = vsel %vm1293_vm7, %v2123_v22, %v1259_v55 }
 0x5af   :  { %v1299_v26 = vmul.f32 %v1378_v31, %v1294_v16 }
 0x5b1   :  { %1300 = vadd.xlane.f32.xlu0 %v1299_v26 }
 0x624   :  { %v1301_v34 = vpop.xlane.xlu0 %1300 }
 0x625   :  { %v1306_v36 = vadd.f32 %v1379_v33, %v1301_v34 }
 0x627   :  { %v1373_v37 = vmul.f32 -1.442695, %v1306_v36 }
 0x629   :  { %1508 = vpow2.f32 %v1373_v37 }
 0x62f   :  { %v1509_v45 = vpop.eup %1508 }
 0x630   :  { %v1310_v46 = vadd.f32 1.0, %v1509_v45 }
 0x632   :  { %1510 = vrcp.f32 %v1310_v46  ;;  %v1322_v60 = vand.u32 2147483648, %v1310_v46  ;;  %v1320_v0 = vand.u32 2147483647, %v1310_v46  ;;  %vm1316_vm9 = vweird.f32 %v1310_v46 }
 0x634   :  { %v1323_v22 = vor.u32 1.1754944e-38, %v1322_v60  ;;  %vm1321_vm12 = vcmp.eq.f32.partialorder %v1320_v0, 8.507059e+37 }
 0x638   :  { %v1511_v49 = vpop.eup %1510 }
 0x639   :  { %v1312_v50 = vmul.f32 %v1511_v49, %v1310_v46  ;;  %vm1317_vm8 = vweird.f32 %v1511_v49 }
 0x63a   :  { %vm1318_vm10 = vmor %vm1316_vm9, %vm1317_vm8 }
 0x63b   :  { %v1313_v57 = vsub.f32 1.0, %v1312_v50 }
 0x63d   :  { %v1314_v63 = vmul.f32 %v1511_v49, %v1313_v57 }
 0x63f   :  { %v1315_v29 = vadd.f32 %v1511_v49, %v1314_v63 }
 0x641   :  { %v1319_v18 = vsel %vm1318_vm10, %v1511_v49, %v1315_v29 }
 0x642   :  { %v1324_v8 = vsel %vm1321_vm12, %v1323_v22, %v1319_v18 }
 0x643   :  { %1327 = vst.msk [vmem:[%s2143_s6] sm:$0xff] %vm1326_vm11, %v1324_v8 }
 0x644   :  { %1332 = vsyncpa [#allocation4], 1 }

</bundles_post_ra>
